<compile_context>
chip_gen: v7x
topology: tpu7x:2x2x1
jax: 0.10.0
libtpu: 0.0.40
codegen_flags: <defaults>
</compile_context>

<pallas_src>
import functools

import jax
import jax.numpy as jnp
from jax import lax
from jax.experimental import pallas as pl
from jax.experimental.pallas import tpu as pltpu


# ----------------------------- config (synthetic stand-in) ------------------ #
VOCAB = 64
HIDDEN = 32
HEADS = 2
LAYERS = 2
FFN = 64
MAX_POS = 16

VMEM_LIMIT = 32 * 1024 * 1024   # safe on v5e/v6e (128 MiB) and v7x (64 MiB)


# ----------------------------- tile helpers --------------------------------- #

def _pick_tile_m(m, target=256):
    """Largest multiple of 8 dividing m, <= target, leaving >=2 grid steps when
    m >= 16 so the Pallas pipeline actually overlaps DMA with compute."""
    if m % 8 != 0 or m < 16:
        return m
    cap = min(target, m // 2)
    t = max(8, cap - cap % 8)
    while m % t:
        t -= 8
    return t


def _pick_tile_k(k, target=512):
    """K-tile: multiple of 128 dividing k, else full K (lane-dim constraint)."""
    if k % 128 != 0:
        return k
    t = min(target, k)
    t -= t % 128
    while k % t:
        t -= 128
    return t


# ----------------------------- Pallas kernels ------------------------------- #

def dense_kernel(x_ref, w_ref, b_ref, o_ref, acc_ref, *, activation):
    """o = act(x @ w + b), K-accumulated in an f32 VMEM scratch."""
    k = pl.program_id(1)

    @pl.when(k == 0)
    def _():
        acc_ref[...] = jnp.zeros_like(acc_ref)

    acc_ref[...] += jnp.dot(x_ref[...], w_ref[...],
                            preferred_element_type=jnp.float32)

    @pl.when(k == pl.num_programs(1) - 1)
    def _():
        y = acc_ref[...] + b_ref[...]
        if activation == "gelu":
            # tanh-approx GELU (HF "gelu_new")
            y = 0.5 * y * (1.0 + jnp.tanh(0.7978845608028654
                                          * (y + 0.044715 * y * y * y)))
        o_ref[...] = y.astype(o_ref.dtype)


def dense_res_ln_kernel(x_ref, w_ref, b_ref, res_ref, g_ref, bt_ref,
                        o_ref, acc_ref, *, eps):
    """o = LayerNorm(x @ w + b + res) * gamma + beta  (fused epilogue)."""
    k = pl.program_id(1)

    @pl.when(k == 0)
    def _():
        acc_ref[...] = jnp.zeros_like(acc_ref)

    acc_ref[...] += jnp.dot(x_ref[...], w_ref[...],
                            preferred_element_type=jnp.float32)

    @pl.when(k == pl.num_programs(1) - 1)
    def _():
        y = acc_ref[...] + b_ref[...] + res_ref[...]
        mean = jnp.mean(y, axis=-1, keepdims=True)
        var = jnp.mean((y - mean) ** 2, axis=-1, keepdims=True)
        inv = lax.rsqrt(var + eps)
        o_ref[...] = ((y - mean) * inv * g_ref[...] + bt_ref[...]).astype(o_ref.dtype)


def layernorm_kernel(x_ref, g_ref, b_ref, o_ref, *, eps):
    """Plain LayerNorm (no residual) for the embedding output."""
    x = x_ref[...]
    mean = jnp.mean(x, axis=-1, keepdims=True)
    var = jnp.mean((x - mean) ** 2, axis=-1, keepdims=True)
    inv = lax.rsqrt(var + eps)
    o_ref[...] = ((x - mean) * inv * g_ref[...] + b_ref[...]).astype(o_ref.dtype)


def attention_kernel(qkv_ref, mask_ref, o_ref, *, heads, scale):
    """One batch element, all heads.  qkv tile: (1, S, 3D); mask: (1, 1, S).
    Head split is done with static slices of the fused QKV tile; scores use
    dot_general contracting on Dh (no transpose), softmax divide goes to EUP."""
    S = qkv_ref.shape[1]
    D = qkv_ref.shape[2] // 3
    Dh = D // heads
    bias = (1.0 - mask_ref[0]) * (-1e9)          # (1, S) additive mask bias

    ctx_heads = []
    for h in range(heads):                       # unrolled static head loop
        q = qkv_ref[0, :, h * Dh:(h + 1) * Dh]               # (S, Dh)
        k = qkv_ref[0, :, D + h * Dh:D + (h + 1) * Dh]       # (S, Dh)
        v = qkv_ref[0, :, 2 * D + h * Dh:2 * D + (h + 1) * Dh]

        s = lax.dot_general(q, k, (((1,), (1,)), ((), ())),
                            preferred_element_type=jnp.float32)
        s = s * scale + bias                                 # (S, S)
        m = jnp.max(s, axis=-1, keepdims=True)
        p = jnp.exp(s - m)
        p = p * pl.reciprocal(jnp.sum(p, axis=-1, keepdims=True), approx=True)
        ctx_heads.append(jnp.dot(p, v, preferred_element_type=jnp.float32))

    # single lane-dense (S, D) store
    o_ref[0] = jnp.concatenate(ctx_heads, axis=-1).astype(o_ref.dtype)


# ----------------------------- Pallas wrappers ------------------------------ #

def dense(x2d, w, b, activation=None):
    M, K = x2d.shape
    N = w.shape[1]
    tm = _pick_tile_m(M)
    tk = _pick_tile_k(K)
    kern = functools.partial(dense_kernel, activation=activation)
    ce = pl.CostEstimate(flops=2 * M * K * N,
                         transcendentals=(M * N if activation == "gelu" else 0),
                         bytes_accessed=4 * (M * K + K * N + M * N + N))
    return pl.pallas_call(
        kern,
        out_shape=jax.ShapeDtypeStruct((M, N), jnp.float32),
        grid_spec=pltpu.PrefetchScalarGridSpec(
            num_scalar_prefetch=0,
            grid=(M // tm, K // tk),
            in_specs=[
                pl.BlockSpec((tm, tk), lambda i, k: (i, k)),
                pl.BlockSpec((tk, N), lambda i, k: (k, 0)),
                pl.BlockSpec((1, N), lambda i, k: (0, 0)),
            ],
            out_specs=pl.BlockSpec((tm, N), lambda i, k: (i, 0)),
            scratch_shapes=[pltpu.VMEM((tm, N), jnp.float32)],
        ),
        compiler_params=pltpu.CompilerParams(
            dimension_semantics=("parallel", "arbitrary"),
            vmem_limit_bytes=VMEM_LIMIT),
        cost_estimate=ce,
    )(x2d, w, b.reshape(1, N))


def dense_res_ln(x2d, w, b, res2d, gamma, beta, eps=1e-12):
    M, K = x2d.shape
    N = w.shape[1]
    tm = _pick_tile_m(M)
    tk = _pick_tile_k(K)
    kern = functools.partial(dense_res_ln_kernel, eps=eps)
    ce = pl.CostEstimate(flops=2 * M * K * N + 10 * M * N,
                         transcendentals=M,
                         bytes_accessed=4 * (M * K + K * N + 2 * M * N + 3 * N))
    return pl.pallas_call(
        kern,
        out_shape=jax.ShapeDtypeStruct((M, N), jnp.float32),
        grid_spec=pltpu.PrefetchScalarGridSpec(
            num_scalar_prefetch=0,
            grid=(M // tm, K // tk),
            in_specs=[
                pl.BlockSpec((tm, tk), lambda i, k: (i, k)),
                pl.BlockSpec((tk, N), lambda i, k: (k, 0)),
                pl.BlockSpec((1, N), lambda i, k: (0, 0)),
                pl.BlockSpec((tm, N), lambda i, k: (i, 0)),
                pl.BlockSpec((1, N), lambda i, k: (0, 0)),
                pl.BlockSpec((1, N), lambda i, k: (0, 0)),
            ],
            out_specs=pl.BlockSpec((tm, N), lambda i, k: (i, 0)),
            scratch_shapes=[pltpu.VMEM((tm, N), jnp.float32)],
        ),
        compiler_params=pltpu.CompilerParams(
            dimension_semantics=("parallel", "arbitrary"),
            vmem_limit_bytes=VMEM_LIMIT),
        cost_estimate=ce,
    )(x2d, w, b.reshape(1, N), res2d, gamma.reshape(1, N), beta.reshape(1, N))


def layernorm(x2d, gamma, beta, eps=1e-12):
    M, D = x2d.shape
    tm = _pick_tile_m(M)
    return pl.pallas_call(
        functools.partial(layernorm_kernel, eps=eps),
        out_shape=jax.ShapeDtypeStruct((M, D), jnp.float32),
        grid_spec=pltpu.PrefetchScalarGridSpec(
            num_scalar_prefetch=0,
            grid=(M // tm,),
            in_specs=[
                pl.BlockSpec((tm, D), lambda i: (i, 0)),
                pl.BlockSpec((1, D), lambda i: (0, 0)),
                pl.BlockSpec((1, D), lambda i: (0, 0)),
            ],
            out_specs=pl.BlockSpec((tm, D), lambda i: (i, 0)),
        ),
        compiler_params=pltpu.CompilerParams(
            dimension_semantics=("parallel",),
            vmem_limit_bytes=VMEM_LIMIT),
    )(x2d, gamma.reshape(1, D), beta.reshape(1, D))


def attention(qkv3d, mask3d, heads, scale):
    """qkv3d: (B, S, 3D) fused QKV activations; mask3d: (B, 1, S) float mask."""
    B, S, threeD = qkv3d.shape
    D = threeD // 3
    Dh = D // heads
    kern = functools.partial(attention_kernel, heads=heads, scale=scale)
    ce = pl.CostEstimate(flops=4 * B * heads * S * S * Dh,
                         transcendentals=B * heads * S * S,
                         bytes_accessed=4 * (B * S * threeD + B * S + B * S * D))
    return pl.pallas_call(
        kern,
        out_shape=jax.ShapeDtypeStruct((B, S, D), jnp.float32),
        grid_spec=pltpu.PrefetchScalarGridSpec(
            num_scalar_prefetch=0,
            grid=(B,),
            in_specs=[
                pl.BlockSpec((1, S, threeD), lambda b: (b, 0, 0)),
                pl.BlockSpec((1, 1, S), lambda b: (b, 0, 0)),
            ],
            out_specs=pl.BlockSpec((1, S, D), lambda b: (b, 0, 0)),
        ),
        compiler_params=pltpu.CompilerParams(
            dimension_semantics=("parallel",),
            vmem_limit_bytes=VMEM_LIMIT),
        cost_estimate=ce,
    )(qkv3d, mask3d)


# ----------------------------- model definition ----------------------------- #

def init_params(key):
    def nrm(k, shape, std=0.02):
        return std * jax.random.normal(k, shape, dtype=jnp.float32)

    keys = iter(jax.random.split(key, 4 + LAYERS * 8))
    p = {
        "word_emb": nrm(next(keys), (VOCAB, HIDDEN)),
        "pos_emb": nrm(next(keys), (MAX_POS, HIDDEN)),
        "type_emb": nrm(next(keys), (2, HIDDEN)),
        "emb_ln_g": jnp.ones((HIDDEN,), jnp.float32),
        "emb_ln_b": jnp.zeros((HIDDEN,), jnp.float32),
        "layers": [],
    }
    for _ in range(LAYERS):
        lyr = {
            # fused QKV weight: (D, 3D)
            "wqkv": nrm(next(keys), (HIDDEN, 3 * HIDDEN)),
            "bqkv": jnp.zeros((3 * HIDDEN,), jnp.float32),
            "wo": nrm(next(keys), (HIDDEN, HIDDEN)),
            "bo": jnp.zeros((HIDDEN,), jnp.float32),
            "ln1_g": jnp.ones((HIDDEN,), jnp.float32),
            "ln1_b": jnp.zeros((HIDDEN,), jnp.float32),
            "w1": nrm(next(keys), (HIDDEN, FFN)),
            "b1": jnp.zeros((FFN,), jnp.float32),
            "w2": nrm(next(keys), (FFN, HIDDEN)),
            "b2": jnp.zeros((HIDDEN,), jnp.float32),
            "ln2_g": jnp.ones((HIDDEN,), jnp.float32),
            "ln2_b": jnp.zeros((HIDDEN,), jnp.float32),
        }
        p["layers"].append(lyr)
    return p


@jax.jit
def basemodel_forward(params, input_ids, attention_mask):
    """Equivalent of Basemodel.forward -> last_hidden_state, shape (B,S,HIDDEN)."""
    B, S = input_ids.shape
    D, H = HIDDEN, HEADS
    Dh = D // H
    scale = 1.0 / (Dh ** 0.5)
    M = B * S

    # embeddings (gather is XLA glue), then Pallas LayerNorm (no zeros residual)
    emb = (jnp.take(params["word_emb"], input_ids, axis=0)
           + params["pos_emb"][:S][None, :, :]
           + params["type_emb"][0][None, None, :])             # (B, S, D)
    xf = layernorm(emb.reshape(M, D), params["emb_ln_g"], params["emb_ln_b"])

    # compact mask, (B, 1, S); the -1e9 bias is formed inside the kernel
    mask3d = attention_mask.astype(jnp.float32).reshape(B, 1, S)

    for lyr in params["layers"]:
        # fused QKV projection: one matmul, lane-dense 3D output
        qkv = dense(xf, lyr["wqkv"], lyr["bqkv"])               # (M, 3D)
        # attention per batch element, all heads, in-kernel head slicing
        ctx = attention(qkv.reshape(B, S, 3 * D), mask3d, H, scale)  # (B, S, D)
        # output projection + residual + LayerNorm, fused
        xf = dense_res_ln(ctx.reshape(M, D), lyr["wo"], lyr["bo"], xf,
                          lyr["ln1_g"], lyr["ln1_b"])
        # FFN: up-proj + GELU fused; down-proj + residual + LayerNorm fused
        h = dense(xf, lyr["w1"], lyr["b1"], activation="gelu")  # (M, FFN)
        xf = dense_res_ln(h, lyr["w2"], lyr["b2"], xf,
                          lyr["ln2_g"], lyr["ln2_b"])

    return xf.reshape(B, S, D)   # last_hidden_state


# ----------------------------- pure-JAX reference ---------------------------- #

def reference_forward(params, input_ids, attention_mask):
    B, S = input_ids.shape
    D, H = HIDDEN, HEADS
    Dh = D // H
    scale = 1.0 / (Dh ** 0.5)

    def ln(x, g, b, eps=1e-12):
        mu = x.mean(-1, keepdims=True)
        var = ((x - mu) ** 2).mean(-1, keepdims=True)
        return (x - mu) / jnp.sqrt(var + eps) * g + b

    emb = (params["word_emb"][input_ids] + params["pos_emb"][:S][None]
           + params["type_emb"][0][None, None])
    x = ln(emb, params["emb_ln_g"], params["emb_ln_b"])
    mbias = (1.0 - attention_mask.astype(jnp.float32)) * -1e9   # (B, S)

    for lyr in params["layers"]:
        qkv = x @ lyr["wqkv"] + lyr["bqkv"]
        q, k, v = jnp.split(qkv, 3, axis=-1)
        to_h = lambda t: t.reshape(B, S, H, Dh).transpose(0, 2, 1, 3)
        q, k, v = to_h(q), to_h(k), to_h(v)
        s = jnp.einsum("bhqd,bhkd->bhqk", q, k) * scale + mbias[:, None, None, :]
        p = jax.nn.softmax(s, axis=-1)
        ctx = jnp.einsum("bhqk,bhkd->bhqd", p, v).transpose(0, 2, 1, 3).reshape(B, S, D)
        x = ln(ctx @ lyr["wo"] + lyr["bo"] + x, lyr["ln1_g"], lyr["ln1_b"])
        hdn = x @ lyr["w1"] + lyr["b1"]
        hdn = 0.5 * hdn * (1.0 + jnp.tanh(0.7978845608028654
                                          * (hdn + 0.044715 * hdn ** 3)))
        x = ln(hdn @ lyr["w2"] + lyr["b2"] + x, lyr["ln2_g"], lyr["ln2_b"])
    return x


# ----------------------------------- main ------------------------------------ #

if __name__ == "__main__":
    key = jax.random.PRNGKey(0)
    pkey, ikey = jax.random.split(key)

    params = init_params(pkey)

    B, S = 2, 8
    input_ids = jax.random.randint(ikey, (B, S), 0, VOCAB, dtype=jnp.int32)
    # second sequence has 2 padding tokens at the end
    attention_mask = jnp.array(
        [[1, 1, 1, 1, 1, 1, 1, 1],
         [1, 1, 1, 1, 1, 1, 0, 0]], dtype=jnp.int32)

    last_hidden = basemodel_forward(params, input_ids, attention_mask)
    jax.block_until_ready(last_hidden)

    assert last_hidden.shape == (B, S, HIDDEN)
    assert jnp.all(jnp.isfinite(last_hidden))

    ref = reference_forward(params, input_ids, attention_mask)
    max_err = float(jnp.max(jnp.abs(last_hidden - ref)))
    assert max_err < 2e-2, f"mismatch vs reference: {max_err}"

    print("KERNEL_OK")
</pallas_src>

<mosaic_0001>
module attributes {stable_mosaic.version = 11 : i64} {
  func.func @layernorm_kernel(%arg0: i32, %arg1: memref<8x32xf32, #tpu.memory_space<vmem>>, %arg2: memref<1x32xf32, #tpu.memory_space<vmem>>, %arg3: memref<1x32xf32, #tpu.memory_space<vmem>>, %arg4: memref<8x32xf32, #tpu.memory_space<vmem>>) attributes {dimension_semantics = [#tpu.dimension_semantics<parallel>], iteration_bounds = array<i64: 2>, scalar_prefetch = 0 : i64, scratch_operands = 0 : i64, tpu.core_type = #tpu.core_type<tc>, window_params = [{transform_indices = @transform_0, window_bounds = array<i64: 8, 32>}, {pipeline_mode = #tpu.pipeline_mode<synchronous>, transform_indices = @transform_1, window_bounds = array<i64: 1, 32>}, {pipeline_mode = #tpu.pipeline_mode<synchronous>, transform_indices = @transform_2, window_bounds = array<i64: 1, 32>}, {transform_indices = @transform_3, window_bounds = array<i64: 8, 32>}]} {
    %c0 = arith.constant 0 : index
    %c0_0 = arith.constant 0 : index
    %0 = vector.load %arg1[%c0, %c0_0] : memref<8x32xf32, #tpu.memory_space<vmem>>, vector<8x32xf32>
    %cst = arith.constant dense<0.000000e+00> : vector<8xf32>
    %1 = vector.multi_reduction <add>, %0, %cst [1] : vector<8x32xf32> to vector<8xf32>
    %2 = vector.shape_cast %1 : vector<8xf32> to vector<8x1xf32>
    %cst_1 = arith.constant 3.200000e+01 : f32
    %3 = vector.broadcast %cst_1 : f32 to vector<8x1xf32>
    %4 = arith.divf %2, %3 : vector<8x1xf32>
    %5 = vector.broadcast %4 : vector<8x1xf32> to vector<8x32xf32>
    %6 = arith.subf %0, %5 : vector<8x32xf32>
    %7 = arith.mulf %6, %6 : vector<8x32xf32>
    %cst_2 = arith.constant dense<0.000000e+00> : vector<8xf32>
    %8 = vector.multi_reduction <add>, %7, %cst_2 [1] : vector<8x32xf32> to vector<8xf32>
    %9 = vector.shape_cast %8 : vector<8xf32> to vector<8x1xf32>
    %cst_3 = arith.constant 3.200000e+01 : f32
    %10 = vector.broadcast %cst_3 : f32 to vector<8x1xf32>
    %11 = arith.divf %9, %10 : vector<8x1xf32>
    %cst_4 = arith.constant 9.99999996E-13 : f32
    %12 = vector.broadcast %cst_4 : f32 to vector<8x1xf32>
    %13 = arith.addf %11, %12 : vector<8x1xf32>
    %14 = math.rsqrt %13 : vector<8x1xf32>
    %15 = vector.broadcast %4 : vector<8x1xf32> to vector<8x32xf32>
    %16 = arith.subf %0, %15 : vector<8x32xf32>
    %17 = vector.broadcast %14 : vector<8x1xf32> to vector<8x32xf32>
    %18 = arith.mulf %16, %17 : vector<8x32xf32>
    %c0_5 = arith.constant 0 : index
    %c0_6 = arith.constant 0 : index
    %19 = vector.load %arg2[%c0_5, %c0_6] : memref<1x32xf32, #tpu.memory_space<vmem>>, vector<1x32xf32>
    %20 = vector.broadcast %19 : vector<1x32xf32> to vector<8x32xf32>
    %21 = arith.mulf %18, %20 : vector<8x32xf32>
    %c0_7 = arith.constant 0 : index
    %c0_8 = arith.constant 0 : index
    %22 = vector.load %arg3[%c0_7, %c0_8] : memref<1x32xf32, #tpu.memory_space<vmem>>, vector<1x32xf32>
    %23 = vector.broadcast %22 : vector<1x32xf32> to vector<8x32xf32>
    %24 = arith.addf %21, %23 : vector<8x32xf32>
    %c0_9 = arith.constant 0 : index
    %c0_10 = arith.constant 0 : index
    %25 = vector.load %arg4[%c0_9, %c0_10] : memref<8x32xf32, #tpu.memory_space<vmem>>, vector<8x32xf32>
    tpu.vector_store %arg4[%c0_9, %c0_10], %24 {strides = array<i32>} : memref<8x32xf32, #tpu.memory_space<vmem>>, vector<8x32xf32>,
    return
  }
  func.func @transform_0(%arg0: i32) -> (i32, i32) {
    %c0_i32 = arith.constant 0 : i32
    %c0_i32_0 = arith.constant 0 : i32
    return %arg0, %c0_i32 : i32, i32
  }
  func.func @transform_1(%arg0: i32) -> (i32, i32) {
    %c0_i32 = arith.constant 0 : i32
    %c0_i32_0 = arith.constant 0 : i32
    %c0_i32_1 = arith.constant 0 : i32
    return %c0_i32, %c0_i32_0 : i32, i32
  }
  func.func @transform_2(%arg0: i32) -> (i32, i32) {
    %c0_i32 = arith.constant 0 : i32
    %c0_i32_0 = arith.constant 0 : i32
    %c0_i32_1 = arith.constant 0 : i32
    return %c0_i32, %c0_i32_0 : i32, i32
  }
  func.func @transform_3(%arg0: i32) -> (i32, i32) {
    %c0_i32 = arith.constant 0 : i32
    %c0_i32_0 = arith.constant 0 : i32
    return %arg0, %c0_i32 : i32, i32
  }
}

module attributes {stable_mosaic.version = 11 : i64} {
  func.func @dense_kernel(%arg0: i32, %arg1: i32, %arg2: memref<8x32xf32, #tpu.memory_space<vmem>>, %arg3: memref<32x96xf32, #tpu.memory_space<vmem>>, %arg4: memref<1x96xf32, #tpu.memory_space<vmem>>, %arg5: memref<8x96xf32, #tpu.memory_space<vmem>>, %arg6: memref<8x96xf32, #tpu.memory_space<vmem>>) attributes {dimension_semantics = [#tpu.dimension_semantics<parallel>, #tpu.dimension_semantics<arbitrary>], iteration_bounds = array<i64: 2, 1>, scalar_prefetch = 0 : i64, scratch_operands = 1 : i64, tpu.core_type = #tpu.core_type<tc>, window_params = [{transform_indices = @transform_0, window_bounds = array<i64: 8, 32>}, {transform_indices = @transform_1, window_bounds = array<i64: 32, 96>}, {pipeline_mode = #tpu.pipeline_mode<synchronous>, transform_indices = @transform_2, window_bounds = array<i64: 1, 96>}, {transform_indices = @transform_3, window_bounds = array<i64: 8, 96>}]} {
    %c0_i32 = arith.constant 0 : i32
    %0 = arith.cmpi eq, %arg1, %c0_i32 : i32
    %1 = arith.extui %0 : i1 to i32
    %c0_i32_0 = arith.constant 0 : i32
    %2 = arith.cmpi ne, %1, %c0_i32_0 : i32
    scf.if %2 {
      %cst_10 = arith.constant 0.000000e+00 : f32
      %12 = vector.broadcast %cst_10 : f32 to vector<8x96xf32>
      %c0_11 = arith.constant 0 : index
      %c0_12 = arith.constant 0 : index
      %13 = vector.load %arg6[%c0_11, %c0_12] : memref<8x96xf32, #tpu.memory_space<vmem>>, vector<8x96xf32>
      tpu.vector_store %arg6[%c0_11, %c0_12], %12 {strides = array<i32>} : memref<8x96xf32, #tpu.memory_space<vmem>>, vector<8x96xf32>,
    } else {
    }
    %c0 = arith.constant 0 : index
    %c0_1 = arith.constant 0 : index
    %3 = vector.load %arg6[%c0, %c0_1] : memref<8x96xf32, #tpu.memory_space<vmem>>, vector<8x96xf32>
    %c0_2 = arith.constant 0 : index
    %c0_3 = arith.constant 0 : index
    %4 = vector.load %arg2[%c0_2, %c0_3] : memref<8x32xf32, #tpu.memory_space<vmem>>, vector<8x32xf32>
    %c0_4 = arith.constant 0 : index
    %c0_5 = arith.constant 0 : index
    %5 = vector.load %arg3[%c0_4, %c0_5] : memref<32x96xf32, #tpu.memory_space<vmem>>, vector<32x96xf32>
    %cst = arith.constant dense<0.000000e+00> : vector<8x96xf32>
    %6 = tpu.matmul %4, %5, %cst {dimension_numbers = #tpu.dot_dimension_numbers<[1], [0], [0], [1], [0, 0, 1, 1], [], []>} : vector<8x32xf32>, vector<32x96xf32>, vector<8x96xf32> -> vector<8x96xf32>
    %7 = arith.addf %3, %6 : vector<8x96xf32>
    %c0_6 = arith.constant 0 : index
    %c0_7 = arith.constant 0 : index
    %8 = vector.load %arg6[%c0_6, %c0_7] : memref<8x96xf32, #tpu.memory_space<vmem>>, vector<8x96xf32>
    tpu.vector_store %arg6[%c0_6, %c0_7], %7 {strides = array<i32>} : memref<8x96xf32, #tpu.memory_space<vmem>>, vector<8x96xf32>,
    %c0_i32_8 = arith.constant 0 : i32
    %9 = arith.cmpi eq, %arg1, %c0_i32_8 : i32
    %10 = arith.extui %9 : i1 to i32
    %c0_i32_9 = arith.constant 0 : i32
    %11 = arith.cmpi ne, %10, %c0_i32_9 : i32
    scf.if %11 {
      %c0_10 = arith.constant 0 : index
      %c0_11 = arith.constant 0 : index
      %12 = vector.load %arg6[%c0_10, %c0_11] : memref<8x96xf32, #tpu.memory_space<vmem>>, vector<8x96xf32>
      %c0_12 = arith.constant 0 : index
      %c0_13 = arith.constant 0 : index
      %13 = vector.load %arg4[%c0_12, %c0_13] : memref<1x96xf32, #tpu.memory_space<vmem>>, vector<1x96xf32>
      %14 = vector.broadcast %13 : vector<1x96xf32> to vector<8x96xf32>
      %15 = arith.addf %12, %14 : vector<8x96xf32>
      %c0_14 = arith.constant 0 : index
      %c0_15 = arith.constant 0 : index
      %16 = vector.load %arg5[%c0_14, %c0_15] : memref<8x96xf32, #tpu.memory_space<vmem>>, vector<8x96xf32>
      tpu.vector_store %arg5[%c0_14, %c0_15], %15 {strides = array<i32>} : memref<8x96xf32, #tpu.memory_space<vmem>>, vector<8x96xf32>,
    } else {
    }
    return
  }
  func.func @transform_0(%arg0: i32, %arg1: i32) -> (i32, i32) {
    %c0_i32 = arith.constant 0 : i32
    return %arg0, %arg1 : i32, i32
  }
  func.func @transform_1(%arg0: i32, %arg1: i32) -> (i32, i32) {
    %c0_i32 = arith.constant 0 : i32
    %c0_i32_0 = arith.constant 0 : i32
    return %arg1, %c0_i32 : i32, i32
  }
  func.func @transform_2(%arg0: i32, %arg1: i32) -> (i32, i32) {
    %c0_i32 = arith.constant 0 : i32
    %c0_i32_0 = arith.constant 0 : i32
    %c0_i32_1 = arith.constant 0 : i32
    return %c0_i32, %c0_i32_0 : i32, i32
  }
  func.func @transform_3(%arg0: i32, %arg1: i32) -> (i32, i32) {
    %c0_i32 = arith.constant 0 : i32
    %c0_i32_0 = arith.constant 0 : i32
    return %arg0, %c0_i32 : i32, i32
  }
}

module attributes {stable_mosaic.version = 11 : i64} {
  func.func @dense_res_ln_kernel(%arg0: i32, %arg1: i32, %arg2: memref<8x32xf32, #tpu.memory_space<vmem>>, %arg3: memref<32x32xf32, #tpu.memory_space<vmem>>, %arg4: memref<1x32xf32, #tpu.memory_space<vmem>>, %arg5: memref<8x32xf32, #tpu.memory_space<vmem>>, %arg6: memref<1x32xf32, #tpu.memory_space<vmem>>, %arg7: memref<1x32xf32, #tpu.memory_space<vmem>>, %arg8: memref<8x32xf32, #tpu.memory_space<vmem>>, %arg9: memref<8x32xf32, #tpu.memory_space<vmem>>) attributes {dimension_semantics = [#tpu.dimension_semantics<parallel>, #tpu.dimension_semantics<arbitrary>], iteration_bounds = array<i64: 2, 1>, scalar_prefetch = 0 : i64, scratch_operands = 1 : i64, tpu.core_type = #tpu.core_type<tc>, window_params = [{transform_indices = @transform_0, window_bounds = array<i64: 8, 32>}, {transform_indices = @transform_1, window_bounds = array<i64: 32, 32>}, {pipeline_mode = #tpu.pipeline_mode<synchronous>, transform_indices = @transform_2, window_bounds = array<i64: 1, 32>}, {transform_indices = @transform_3, window_bounds = array<i64: 8, 32>}, {pipeline_mode = #tpu.pipeline_mode<synchronous>, transform_indices = @transform_4, window_bounds = array<i64: 1, 32>}, {pipeline_mode = #tpu.pipeline_mode<synchronous>, transform_indices = @transform_5, window_bounds = array<i64: 1, 32>}, {transform_indices = @transform_6, window_bounds = array<i64: 8, 32>}]} {
    %c0_i32 = arith.constant 0 : i32
    %0 = arith.cmpi eq, %arg1, %c0_i32 : i32
    %1 = arith.extui %0 : i1 to i32
    %c0_i32_0 = arith.constant 0 : i32
    %2 = arith.cmpi ne, %1, %c0_i32_0 : i32
    scf.if %2 {
      %cst_10 = arith.constant 0.000000e+00 : f32
      %12 = vector.broadcast %cst_10 : f32 to vector<8x32xf32>
      %c0_11 = arith.constant 0 : index
      %c0_12 = arith.constant 0 : index
      %13 = vector.load %arg9[%c0_11, %c0_12] : memref<8x32xf32, #tpu.memory_space<vmem>>, vector<8x32xf32>
      tpu.vector_store %arg9[%c0_11, %c0_12], %12 {strides = array<i32>} : memref<8x32xf32, #tpu.memory_space<vmem>>, vector<8x32xf32>,
    } else {
    }
    %c0 = arith.constant 0 : index
    %c0_1 = arith.constant 0 : index
    %3 = vector.load %arg9[%c0, %c0_1] : memref<8x32xf32, #tpu.memory_space<vmem>>, vector<8x32xf32>
    %c0_2 = arith.constant 0 : index
    %c0_3 = arith.constant 0 : index
    %4 = vector.load %arg2[%c0_2, %c0_3] : memref<8x32xf32, #tpu.memory_space<vmem>>, vector<8x32xf32>
    %c0_4 = arith.constant 0 : index
    %c0_5 = arith.constant 0 : index
    %5 = vector.load %arg3[%c0_4, %c0_5] : memref<32x32xf32, #tpu.memory_space<vmem>>, vector<32x32xf32>
    %cst = arith.constant dense<0.000000e+00> : vector<8x32xf32>
    %6 = tpu.matmul %4, %5, %cst {dimension_numbers = #tpu.dot_dimension_numbers<[1], [0], [0], [1], [0, 0, 1, 1], [], []>} : vector<8x32xf32>, vector<32x32xf32>, vector<8x32xf32> -> vector<8x32xf32>
    %7 = arith.addf %3, %6 : vector<8x32xf32>
    %c0_6 = arith.constant 0 : index
    %c0_7 = arith.constant 0 : index
    %8 = vector.load %arg9[%c0_6, %c0_7] : memref<8x32xf32, #tpu.memory_space<vmem>>, vector<8x32xf32>
    tpu.vector_store %arg9[%c0_6, %c0_7], %7 {strides = array<i32>} : memref<8x32xf32, #tpu.memory_space<vmem>>, vector<8x32xf32>,
    %c0_i32_8 = arith.constant 0 : i32
    %9 = arith.cmpi eq, %arg1, %c0_i32_8 : i32
    %10 = arith.extui %9 : i1 to i32
    %c0_i32_9 = arith.constant 0 : i32
    %11 = arith.cmpi ne, %10, %c0_i32_9 : i32
    scf.if %11 {
      %c0_10 = arith.constant 0 : index
      %c0_11 = arith.constant 0 : index
      %12 = vector.load %arg9[%c0_10, %c0_11] : memref<8x32xf32, #tpu.memory_space<vmem>>, vector<8x32xf32>
      %c0_12 = arith.constant 0 : index
      %c0_13 = arith.constant 0 : index
      %13 = vector.load %arg4[%c0_12, %c0_13] : memref<1x32xf32, #tpu.memory_space<vmem>>, vector<1x32xf32>
      %14 = vector.broadcast %13 : vector<1x32xf32> to vector<8x32xf32>
      %15 = arith.addf %12, %14 : vector<8x32xf32>
      %c0_14 = arith.constant 0 : index
      %c0_15 = arith.constant 0 : index
      %16 = vector.load %arg5[%c0_14, %c0_15] : memref<8x32xf32, #tpu.memory_space<vmem>>, vector<8x32xf32>
      %17 = arith.addf %15, %16 : vector<8x32xf32>
      %cst_16 = arith.constant dense<0.000000e+00> : vector<8xf32>
      %18 = vector.multi_reduction <add>, %17, %cst_16 [1] : vector<8x32xf32> to vector<8xf32>
      %19 = vector.shape_cast %18 : vector<8xf32> to vector<8x1xf32>
      %cst_17 = arith.constant 3.200000e+01 : f32
      %20 = vector.broadcast %cst_17 : f32 to vector<8x1xf32>
      %21 = arith.divf %19, %20 : vector<8x1xf32>
      %22 = vector.broadcast %21 : vector<8x1xf32> to vector<8x32xf32>
      %23 = arith.subf %17, %22 : vector<8x32xf32>
      %24 = arith.mulf %23, %23 : vector<8x32xf32>
      %cst_18 = arith.constant dense<0.000000e+00> : vector<8xf32>
      %25 = vector.multi_reduction <add>, %24, %cst_18 [1] : vector<8x32xf32> to vector<8xf32>
      %26 = vector.shape_cast %25 : vector<8xf32> to vector<8x1xf32>
      %cst_19 = arith.constant 3.200000e+01 : f32
      %27 = vector.broadcast %cst_19 : f32 to vector<8x1xf32>
      %28 = arith.divf %26, %27 : vector<8x1xf32>
      %cst_20 = arith.constant 9.99999996E-13 : f32
      %29 = vector.broadcast %cst_20 : f32 to vector<8x1xf32>
      %30 = arith.addf %28, %29 : vector<8x1xf32>
      %31 = math.rsqrt %30 : vector<8x1xf32>
      %32 = vector.broadcast %21 : vector<8x1xf32> to vector<8x32xf32>
      %33 = arith.subf %17, %32 : vector<8x32xf32>
      %34 = vector.broadcast %31 : vector<8x1xf32> to vector<8x32xf32>
      %35 = arith.mulf %33, %34 : vector<8x32xf32>
      %c0_21 = arith.constant 0 : index
      %c0_22 = arith.constant 0 : index
      %36 = vector.load %arg6[%c0_21, %c0_22] : memref<1x32xf32, #tpu.memory_space<vmem>>, vector<1x32xf32>
      %37 = vector.broadcast %36 : vector<1x32xf32> to vector<8x32xf32>
      %38 = arith.mulf %35, %37 : vector<8x32xf32>
      %c0_23 = arith.constant 0 : index
      %c0_24 = arith.constant 0 : index
      %39 = vector.load %arg7[%c0_23, %c0_24] : memref<1x32xf32, #tpu.memory_space<vmem>>, vector<1x32xf32>
      %40 = vector.broadcast %39 : vector<1x32xf32> to vector<8x32xf32>
      %41 = arith.addf %38, %40 : vector<8x32xf32>
      %c0_25 = arith.constant 0 : index
      %c0_26 = arith.constant 0 : index
      %42 = vector.load %arg8[%c0_25, %c0_26] : memref<8x32xf32, #tpu.memory_space<vmem>>, vector<8x32xf32>
      tpu.vector_store %arg8[%c0_25, %c0_26], %41 {strides = array<i32>} : memref<8x32xf32, #tpu.memory_space<vmem>>, vector<8x32xf32>,
    } else {
    }
    return
  }
  func.func @transform_0(%arg0: i32, %arg1: i32) -> (i32, i32) {
    %c0_i32 = arith.constant 0 : i32
    return %arg0, %arg1 : i32, i32
  }
  func.func @transform_1(%arg0: i32, %arg1: i32) -> (i32, i32) {
    %c0_i32 = arith.constant 0 : i32
    %c0_i32_0 = arith.constant 0 : i32
    return %arg1, %c0_i32 : i32, i32
  }
  func.func @transform_2(%arg0: i32, %arg1: i32) -> (i32, i32) {
    %c0_i32 = arith.constant 0 : i32
    %c0_i32_0 = arith.constant 0 : i32
    %c0_i32_1 = arith.constant 0 : i32
    return %c0_i32, %c0_i32_0 : i32, i32
  }
  func.func @transform_3(%arg0: i32, %arg1: i32) -> (i32, i32) {
    %c0_i32 = arith.constant 0 : i32
    %c0_i32_0 = arith.constant 0 : i32
    return %arg0, %c0_i32 : i32, i32
  }
  func.func @transform_4(%arg0: i32, %arg1: i32) -> (i32, i32) {
    %c0_i32 = arith.constant 0 : i32
    %c0_i32_0 = arith.constant 0 : i32
    %c0_i32_1 = arith.constant 0 : i32
    return %c0_i32, %c0_i32_0 : i32, i32
  }
  func.func @transform_5(%arg0: i32, %arg1: i32) -> (i32, i32) {
    %c0_i32 = arith.constant 0 : i32
    %c0_i32_0 = arith.constant 0 : i32
    %c0_i32_1 = arith.constant 0 : i32
    return %c0_i32, %c0_i32_0 : i32, i32
  }
  func.func @transform_6(%arg0: i32, %arg1: i32) -> (i32, i32) {
    %c0_i32 = arith.constant 0 : i32
    %c0_i32_0 = arith.constant 0 : i32
    return %arg0, %c0_i32 : i32, i32
  }
}

module attributes {stable_mosaic.version = 11 : i64} {
  func.func @attention_kernel(%arg0: i32, %arg1: memref<1x8x96xf32, #tpu.memory_space<vmem>>, %arg2: memref<1x1x8xf32, #tpu.memory_space<vmem>>, %arg3: memref<1x8x32xf32, #tpu.memory_space<vmem>>) attributes {dimension_semantics = [#tpu.dimension_semantics<parallel>], iteration_bounds = array<i64: 2>, scalar_prefetch = 0 : i64, scratch_operands = 0 : i64, tpu.core_type = #tpu.core_type<tc>, window_params = [{transform_indices = @transform_0, window_bounds = array<i64: 1, 8, 96>}, {transform_indices = @transform_1, window_bounds = array<i64: 1, 1, 8>}, {transform_indices = @transform_2, window_bounds = array<i64: 1, 8, 32>}]} {
    %c0 = arith.constant 0 : index
    %c0_0 = arith.constant 0 : index
    %c0_1 = arith.constant 0 : index
    %0 = vector.load %arg2[%c0, %c0_0, %c0_1] : memref<1x1x8xf32, #tpu.memory_space<vmem>>, vector<1x1x8xf32>
    %1 = vector.shape_cast %0 : vector<1x1x8xf32> to vector<1x8xf32>
    %cst = arith.constant 1.000000e+00 : f32
    %2 = vector.broadcast %cst : f32 to vector<1x8xf32>
    %3 = arith.subf %2, %1 : vector<1x8xf32>
    %cst_2 = arith.constant -1.000000e+09 : f32
    %4 = vector.broadcast %cst_2 : f32 to vector<1x8xf32>
    %5 = arith.mulf %3, %4 : vector<1x8xf32>
    %c0_3 = arith.constant 0 : index
    %c0_4 = arith.constant 0 : index
    %c0_5 = arith.constant 0 : index
    %6 = vector.load %arg1[%c0_3, %c0_4, %c0_5] : memref<1x8x96xf32, #tpu.memory_space<vmem>>, vector<1x8x16xf32>
    %7 = vector.shape_cast %6 : vector<1x8x16xf32> to vector<8x16xf32>
    %c0_6 = arith.constant 0 : index
    %c0_7 = arith.constant 0 : index
    %c32 = arith.constant 32 : index
    %8 = vector.load %arg1[%c0_6, %c0_7, %c32] : memref<1x8x96xf32, #tpu.memory_space<vmem>>, vector<1x8x16xf32>
    %9 = vector.shape_cast %8 : vector<1x8x16xf32> to vector<8x16xf32>
    %c0_8 = arith.constant 0 : index
    %c0_9 = arith.constant 0 : index
    %c64 = arith.constant 64 : index
    %10 = vector.load %arg1[%c0_8, %c0_9, %c64] : memref<1x8x96xf32, #tpu.memory_space<vmem>>, vector<1x8x16xf32>
    %11 = vector.shape_cast %10 : vector<1x8x16xf32> to vector<8x16xf32>
    %cst_10 = arith.constant dense<0.000000e+00> : vector<8x8xf32>
    %12 = tpu.matmul %7, %9, %cst_10 {dimension_numbers = #tpu.dot_dimension_numbers<[1], [1], [0], [0], [0, 0, 1, 0], [], []>} : vector<8x16xf32>, vector<8x16xf32>, vector<8x8xf32> -> vector<8x8xf32>
    %cst_11 = arith.constant 2.500000e-01 : f32
    %13 = vector.broadcast %cst_11 : f32 to vector<8x8xf32>
    %14 = arith.mulf %12, %13 : vector<8x8xf32>
    %15 = vector.broadcast %5 : vector<1x8xf32> to vector<8x8xf32>
    %16 = arith.addf %14, %15 : vector<8x8xf32>
    %cst_12 = arith.constant dense<0xFF800000> : vector<8xf32>
    %17 = vector.multi_reduction <maximumf>, %16, %cst_12 [1] : vector<8x8xf32> to vector<8xf32>
    %18 = vector.shape_cast %17 : vector<8xf32> to vector<8x1xf32>
    %19 = vector.broadcast %18 : vector<8x1xf32> to vector<8x8xf32>
    %20 = arith.subf %16, %19 : vector<8x8xf32>
    %21 = math.exp %20 : vector<8x8xf32>
    %cst_13 = arith.constant dense<0.000000e+00> : vector<8xf32>
    %22 = vector.multi_reduction <add>, %21, %cst_13 [1] : vector<8x8xf32> to vector<8xf32>
    %23 = vector.shape_cast %22 : vector<8xf32> to vector<8x1xf32>
    %24 = tpu.reciprocal %23 {approx = true} : vector<8x1xf32> -> vector<8x1xf32>
    %25 = vector.broadcast %24 : vector<8x1xf32> to vector<8x8xf32>
    %26 = arith.mulf %21, %25 : vector<8x8xf32>
    %cst_14 = arith.constant dense<0.000000e+00> : vector<8x16xf32>
    %27 = tpu.matmul %26, %11, %cst_14 {dimension_numbers = #tpu.dot_dimension_numbers<[1], [0], [0], [1], [0, 0, 1, 1], [], []>} : vector<8x8xf32>, vector<8x16xf32>, vector<8x16xf32> -> vector<8x16xf32>
    %c0_15 = arith.constant 0 : index
    %c0_16 = arith.constant 0 : index
    %c16 = arith.constant 16 : index
    %28 = vector.load %arg1[%c0_15, %c0_16, %c16] : memref<1x8x96xf32, #tpu.memory_space<vmem>>, vector<1x8x16xf32>
    %29 = vector.shape_cast %28 : vector<1x8x16xf32> to vector<8x16xf32>
    %c0_17 = arith.constant 0 : index
    %c0_18 = arith.constant 0 : index
    %c48 = arith.constant 48 : index
    %30 = vector.load %arg1[%c0_17, %c0_18, %c48] : memref<1x8x96xf32, #tpu.memory_space<vmem>>, vector<1x8x16xf32>
    %31 = vector.shape_cast %30 : vector<1x8x16xf32> to vector<8x16xf32>
    %c0_19 = arith.constant 0 : index
    %c0_20 = arith.constant 0 : index
    %c80 = arith.constant 80 : index
    %32 = vector.load %arg1[%c0_19, %c0_20, %c80] : memref<1x8x96xf32, #tpu.memory_space<vmem>>, vector<1x8x16xf32>
    %33 = vector.shape_cast %32 : vector<1x8x16xf32> to vector<8x16xf32>
    %cst_21 = arith.constant dense<0.000000e+00> : vector<8x8xf32>
    %34 = tpu.matmul %29, %31, %cst_21 {dimension_numbers = #tpu.dot_dimension_numbers<[1], [1], [0], [0], [0, 0, 1, 0], [], []>} : vector<8x16xf32>, vector<8x16xf32>, vector<8x8xf32> -> vector<8x8xf32>
    %cst_22 = arith.constant 2.500000e-01 : f32
    %35 = vector.broadcast %cst_22 : f32 to vector<8x8xf32>
    %36 = arith.mulf %34, %35 : vector<8x8xf32>
    %37 = vector.broadcast %5 : vector<1x8xf32> to vector<8x8xf32>
    %38 = arith.addf %36, %37 : vector<8x8xf32>
    %cst_23 = arith.constant dense<0xFF800000> : vector<8xf32>
    %39 = vector.multi_reduction <maximumf>, %38, %cst_23 [1] : vector<8x8xf32> to vector<8xf32>
    %40 = vector.shape_cast %39 : vector<8xf32> to vector<8x1xf32>
    %41 = vector.broadcast %40 : vector<8x1xf32> to vector<8x8xf32>
    %42 = arith.subf %38, %41 : vector<8x8xf32>
    %43 = math.exp %42 : vector<8x8xf32>
    %cst_24 = arith.constant dense<0.000000e+00> : vector<8xf32>
    %44 = vector.multi_reduction <add>, %43, %cst_24 [1] : vector<8x8xf32> to vector<8xf32>
    %45 = vector.shape_cast %44 : vector<8xf32> to vector<8x1xf32>
    %46 = tpu.reciprocal %45 {approx = true} : vector<8x1xf32> -> vector<8x1xf32>
    %47 = vector.broadcast %46 : vector<8x1xf32> to vector<8x8xf32>
    %48 = arith.mulf %43, %47 : vector<8x8xf32>
    %cst_25 = arith.constant dense<0.000000e+00> : vector<8x16xf32>
    %49 = tpu.matmul %48, %33, %cst_25 {dimension_numbers = #tpu.dot_dimension_numbers<[1], [0], [0], [1], [0, 0, 1, 1], [], []>} : vector<8x8xf32>, vector<8x16xf32>, vector<8x16xf32> -> vector<8x16xf32>
    %50 = tpu.concatenate %27, %49 in 1 : vector<8x16xf32>, vector<8x16xf32> -> vector<8x32xf32>
    %c0_26 = arith.constant 0 : index
    %c0_27 = arith.constant 0 : index
    %c0_28 = arith.constant 0 : index
    %51 = vector.load %arg3[%c0_26, %c0_27, %c0_28] : memref<1x8x32xf32, #tpu.memory_space<vmem>>, vector<1x8x32xf32>
    %52 = vector.shape_cast %51 : vector<1x8x32xf32> to vector<8x32xf32>
    %53 = vector.shape_cast %50 : vector<8x32xf32> to vector<1x8x32xf32>
    tpu.vector_store %arg3[%c0_26, %c0_27, %c0_28], %53 {strides = array<i32>} : memref<1x8x32xf32, #tpu.memory_space<vmem>>, vector<1x8x32xf32>,
    return
  }
  func.func @transform_0(%arg0: i32) -> (i32, i32, i32) {
    %c0_i32 = arith.constant 0 : i32
    %c0_i32_0 = arith.constant 0 : i32
    %c0_i32_1 = arith.constant 0 : i32
    return %arg0, %c0_i32, %c0_i32_0 : i32, i32, i32
  }
  func.func @transform_1(%arg0: i32) -> (i32, i32, i32) {
    %c0_i32 = arith.constant 0 : i32
    %c0_i32_0 = arith.constant 0 : i32
    %c0_i32_1 = arith.constant 0 : i32
    return %arg0, %c0_i32, %c0_i32_0 : i32, i32, i32
  }
  func.func @transform_2(%arg0: i32) -> (i32, i32, i32) {
    %c0_i32 = arith.constant 0 : i32
    %c0_i32_0 = arith.constant 0 : i32
    %c0_i32_1 = arith.constant 0 : i32
    return %arg0, %c0_i32, %c0_i32_0 : i32, i32, i32
  }
}

module attributes {stable_mosaic.version = 11 : i64} {
  func.func @dense_kernel(%arg0: i32, %arg1: i32, %arg2: memref<8x32xf32, #tpu.memory_space<vmem>>, %arg3: memref<32x64xf32, #tpu.memory_space<vmem>>, %arg4: memref<1x64xf32, #tpu.memory_space<vmem>>, %arg5: memref<8x64xf32, #tpu.memory_space<vmem>>, %arg6: memref<8x64xf32, #tpu.memory_space<vmem>>) attributes {dimension_semantics = [#tpu.dimension_semantics<parallel>, #tpu.dimension_semantics<arbitrary>], iteration_bounds = array<i64: 2, 1>, scalar_prefetch = 0 : i64, scratch_operands = 1 : i64, tpu.core_type = #tpu.core_type<tc>, window_params = [{transform_indices = @transform_0, window_bounds = array<i64: 8, 32>}, {transform_indices = @transform_1, window_bounds = array<i64: 32, 64>}, {pipeline_mode = #tpu.pipeline_mode<synchronous>, transform_indices = @transform_2, window_bounds = array<i64: 1, 64>}, {transform_indices = @transform_3, window_bounds = array<i64: 8, 64>}]} {
    %c0_i32 = arith.constant 0 : i32
    %0 = arith.cmpi eq, %arg1, %c0_i32 : i32
    %1 = arith.extui %0 : i1 to i32
    %c0_i32_0 = arith.constant 0 : i32
    %2 = arith.cmpi ne, %1, %c0_i32_0 : i32
    scf.if %2 {
      %cst_10 = arith.constant 0.000000e+00 : f32
      %12 = vector.broadcast %cst_10 : f32 to vector<8x64xf32>
      %c0_11 = arith.constant 0 : index
      %c0_12 = arith.constant 0 : index
      %13 = vector.load %arg6[%c0_11, %c0_12] : memref<8x64xf32, #tpu.memory_space<vmem>>, vector<8x64xf32>
      tpu.vector_store %arg6[%c0_11, %c0_12], %12 {strides = array<i32>} : memref<8x64xf32, #tpu.memory_space<vmem>>, vector<8x64xf32>,
    } else {
    }
    %c0 = arith.constant 0 : index
    %c0_1 = arith.constant 0 : index
    %3 = vector.load %arg6[%c0, %c0_1] : memref<8x64xf32, #tpu.memory_space<vmem>>, vector<8x64xf32>
    %c0_2 = arith.constant 0 : index
    %c0_3 = arith.constant 0 : index
    %4 = vector.load %arg2[%c0_2, %c0_3] : memref<8x32xf32, #tpu.memory_space<vmem>>, vector<8x32xf32>
    %c0_4 = arith.constant 0 : index
    %c0_5 = arith.constant 0 : index
    %5 = vector.load %arg3[%c0_4, %c0_5] : memref<32x64xf32, #tpu.memory_space<vmem>>, vector<32x64xf32>
    %cst = arith.constant dense<0.000000e+00> : vector<8x64xf32>
    %6 = tpu.matmul %4, %5, %cst {dimension_numbers = #tpu.dot_dimension_numbers<[1], [0], [0], [1], [0, 0, 1, 1], [], []>} : vector<8x32xf32>, vector<32x64xf32>, vector<8x64xf32> -> vector<8x64xf32>
    %7 = arith.addf %3, %6 : vector<8x64xf32>
    %c0_6 = arith.constant 0 : index
    %c0_7 = arith.constant 0 : index
    %8 = vector.load %arg6[%c0_6, %c0_7] : memref<8x64xf32, #tpu.memory_space<vmem>>, vector<8x64xf32>
    tpu.vector_store %arg6[%c0_6, %c0_7], %7 {strides = array<i32>} : memref<8x64xf32, #tpu.memory_space<vmem>>, vector<8x64xf32>,
    %c0_i32_8 = arith.constant 0 : i32
    %9 = arith.cmpi eq, %arg1, %c0_i32_8 : i32
    %10 = arith.extui %9 : i1 to i32
    %c0_i32_9 = arith.constant 0 : i32
    %11 = arith.cmpi ne, %10, %c0_i32_9 : i32
    scf.if %11 {
      %c0_10 = arith.constant 0 : index
      %c0_11 = arith.constant 0 : index
      %12 = vector.load %arg6[%c0_10, %c0_11] : memref<8x64xf32, #tpu.memory_space<vmem>>, vector<8x64xf32>
      %c0_12 = arith.constant 0 : index
      %c0_13 = arith.constant 0 : index
      %13 = vector.load %arg4[%c0_12, %c0_13] : memref<1x64xf32, #tpu.memory_space<vmem>>, vector<1x64xf32>
      %14 = vector.broadcast %13 : vector<1x64xf32> to vector<8x64xf32>
      %15 = arith.addf %12, %14 : vector<8x64xf32>
      %cst_14 = arith.constant 5.000000e-01 : f32
      %16 = vector.broadcast %cst_14 : f32 to vector<8x64xf32>
      %17 = arith.mulf %16, %15 : vector<8x64xf32>
      %cst_15 = arith.constant 4.471500e-02 : f32
      %18 = vector.broadcast %cst_15 : f32 to vector<8x64xf32>
      %19 = arith.mulf %18, %15 : vector<8x64xf32>
      %20 = arith.mulf %19, %15 : vector<8x64xf32>
      %21 = arith.mulf %20, %15 : vector<8x64xf32>
      %22 = arith.addf %15, %21 : vector<8x64xf32>
      %cst_16 = arith.constant 0.797884583 : f32
      %23 = vector.broadcast %cst_16 : f32 to vector<8x64xf32>
      %24 = arith.mulf %23, %22 : vector<8x64xf32>
      %25 = math.tanh %24 : vector<8x64xf32>
      %cst_17 = arith.constant 1.000000e+00 : f32
      %26 = vector.broadcast %cst_17 : f32 to vector<8x64xf32>
      %27 = arith.addf %26, %25 : vector<8x64xf32>
      %28 = arith.mulf %17, %27 : vector<8x64xf32>
      %c0_18 = arith.constant 0 : index
      %c0_19 = arith.constant 0 : index
      %29 = vector.load %arg5[%c0_18, %c0_19] : memref<8x64xf32, #tpu.memory_space<vmem>>, vector<8x64xf32>
      tpu.vector_store %arg5[%c0_18, %c0_19], %28 {strides = array<i32>} : memref<8x64xf32, #tpu.memory_space<vmem>>, vector<8x64xf32>,
    } else {
    }
    return
  }
  func.func @transform_0(%arg0: i32, %arg1: i32) -> (i32, i32) {
    %c0_i32 = arith.constant 0 : i32
    return %arg0, %arg1 : i32, i32
  }
  func.func @transform_1(%arg0: i32, %arg1: i32) -> (i32, i32) {
    %c0_i32 = arith.constant 0 : i32
    %c0_i32_0 = arith.constant 0 : i32
    return %arg1, %c0_i32 : i32, i32
  }
  func.func @transform_2(%arg0: i32, %arg1: i32) -> (i32, i32) {
    %c0_i32 = arith.constant 0 : i32
    %c0_i32_0 = arith.constant 0 : i32
    %c0_i32_1 = arith.constant 0 : i32
    return %c0_i32, %c0_i32_0 : i32, i32
  }
  func.func @transform_3(%arg0: i32, %arg1: i32) -> (i32, i32) {
    %c0_i32 = arith.constant 0 : i32
    %c0_i32_0 = arith.constant 0 : i32
    return %arg0, %c0_i32 : i32, i32
  }
}

module attributes {stable_mosaic.version = 11 : i64} {
  func.func @dense_res_ln_kernel(%arg0: i32, %arg1: i32, %arg2: memref<8x64xf32, #tpu.memory_space<vmem>>, %arg3: memref<64x32xf32, #tpu.memory_space<vmem>>, %arg4: memref<1x32xf32, #tpu.memory_space<vmem>>, %arg5: memref<8x32xf32, #tpu.memory_space<vmem>>, %arg6: memref<1x32xf32, #tpu.memory_space<vmem>>, %arg7: memref<1x32xf32, #tpu.memory_space<vmem>>, %arg8: memref<8x32xf32, #tpu.memory_space<vmem>>, %arg9: memref<8x32xf32, #tpu.memory_space<vmem>>) attributes {dimension_semantics = [#tpu.dimension_semantics<parallel>, #tpu.dimension_semantics<arbitrary>], iteration_bounds = array<i64: 2, 1>, scalar_prefetch = 0 : i64, scratch_operands = 1 : i64, tpu.core_type = #tpu.core_type<tc>, window_params = [{transform_indices = @transform_0, window_bounds = array<i64: 8, 64>}, {transform_indices = @transform_1, window_bounds = array<i64: 64, 32>}, {pipeline_mode = #tpu.pipeline_mode<synchronous>, transform_indices = @transform_2, window_bounds = array<i64: 1, 32>}, {transform_indices = @transform_3, window_bounds = array<i64: 8, 32>}, {pipeline_mode = #tpu.pipeline_mode<synchronous>, transform_indices = @transform_4, window_bounds = array<i64: 1, 32>}, {pipeline_mode = #tpu.pipeline_mode<synchronous>, transform_indices = @transform_5, window_bounds = array<i64: 1, 32>}, {transform_indices = @transform_6, window_bounds = array<i64: 8, 32>}]} {
    %c0_i32 = arith.constant 0 : i32
    %0 = arith.cmpi eq, %arg1, %c0_i32 : i32
    %1 = arith.extui %0 : i1 to i32
    %c0_i32_0 = arith.constant 0 : i32
    %2 = arith.cmpi ne, %1, %c0_i32_0 : i32
    scf.if %2 {
      %cst_10 = arith.constant 0.000000e+00 : f32
      %12 = vector.broadcast %cst_10 : f32 to vector<8x32xf32>
      %c0_11 = arith.constant 0 : index
      %c0_12 = arith.constant 0 : index
      %13 = vector.load %arg9[%c0_11, %c0_12] : memref<8x32xf32, #tpu.memory_space<vmem>>, vector<8x32xf32>
      tpu.vector_store %arg9[%c0_11, %c0_12], %12 {strides = array<i32>} : memref<8x32xf32, #tpu.memory_space<vmem>>, vector<8x32xf32>,
    } else {
    }
    %c0 = arith.constant 0 : index
    %c0_1 = arith.constant 0 : index
    %3 = vector.load %arg9[%c0, %c0_1] : memref<8x32xf32, #tpu.memory_space<vmem>>, vector<8x32xf32>
    %c0_2 = arith.constant 0 : index
    %c0_3 = arith.constant 0 : index
    %4 = vector.load %arg2[%c0_2, %c0_3] : memref<8x64xf32, #tpu.memory_space<vmem>>, vector<8x64xf32>
    %c0_4 = arith.constant 0 : index
    %c0_5 = arith.constant 0 : index
    %5 = vector.load %arg3[%c0_4, %c0_5] : memref<64x32xf32, #tpu.memory_space<vmem>>, vector<64x32xf32>
    %cst = arith.constant dense<0.000000e+00> : vector<8x32xf32>
    %6 = tpu.matmul %4, %5, %cst {dimension_numbers = #tpu.dot_dimension_numbers<[1], [0], [0], [1], [0, 0, 1, 1], [], []>} : vector<8x64xf32>, vector<64x32xf32>, vector<8x32xf32> -> vector<8x32xf32>
    %7 = arith.addf %3, %6 : vector<8x32xf32>
    %c0_6 = arith.constant 0 : index
    %c0_7 = arith.constant 0 : index
    %8 = vector.load %arg9[%c0_6, %c0_7] : memref<8x32xf32, #tpu.memory_space<vmem>>, vector<8x32xf32>
    tpu.vector_store %arg9[%c0_6, %c0_7], %7 {strides = array<i32>} : memref<8x32xf32, #tpu.memory_space<vmem>>, vector<8x32xf32>,
    %c0_i32_8 = arith.constant 0 : i32
    %9 = arith.cmpi eq, %arg1, %c0_i32_8 : i32
    %10 = arith.extui %9 : i1 to i32
    %c0_i32_9 = arith.constant 0 : i32
    %11 = arith.cmpi ne, %10, %c0_i32_9 : i32
    scf.if %11 {
      %c0_10 = arith.constant 0 : index
      %c0_11 = arith.constant 0 : index
      %12 = vector.load %arg9[%c0_10, %c0_11] : memref<8x32xf32, #tpu.memory_space<vmem>>, vector<8x32xf32>
      %c0_12 = arith.constant 0 : index
      %c0_13 = arith.constant 0 : index
      %13 = vector.load %arg4[%c0_12, %c0_13] : memref<1x32xf32, #tpu.memory_space<vmem>>, vector<1x32xf32>
      %14 = vector.broadcast %13 : vector<1x32xf32> to vector<8x32xf32>
      %15 = arith.addf %12, %14 : vector<8x32xf32>
      %c0_14 = arith.constant 0 : index
      %c0_15 = arith.constant 0 : index
      %16 = vector.load %arg5[%c0_14, %c0_15] : memref<8x32xf32, #tpu.memory_space<vmem>>, vector<8x32xf32>
      %17 = arith.addf %15, %16 : vector<8x32xf32>
      %cst_16 = arith.constant dense<0.000000e+00> : vector<8xf32>
      %18 = vector.multi_reduction <add>, %17, %cst_16 [1] : vector<8x32xf32> to vector<8xf32>
      %19 = vector.shape_cast %18 : vector<8xf32> to vector<8x1xf32>
      %cst_17 = arith.constant 3.200000e+01 : f32
      %20 = vector.broadcast %cst_17 : f32 to vector<8x1xf32>
      %21 = arith.divf %19, %20 : vector<8x1xf32>
      %22 = vector.broadcast %21 : vector<8x1xf32> to vector<8x32xf32>
      %23 = arith.subf %17, %22 : vector<8x32xf32>
      %24 = arith.mulf %23, %23 : vector<8x32xf32>
      %cst_18 = arith.constant dense<0.000000e+00> : vector<8xf32>
      %25 = vector.multi_reduction <add>, %24, %cst_18 [1] : vector<8x32xf32> to vector<8xf32>
      %26 = vector.shape_cast %25 : vector<8xf32> to vector<8x1xf32>
      %cst_19 = arith.constant 3.200000e+01 : f32
      %27 = vector.broadcast %cst_19 : f32 to vector<8x1xf32>
      %28 = arith.divf %26, %27 : vector<8x1xf32>
      %cst_20 = arith.constant 9.99999996E-13 : f32
      %29 = vector.broadcast %cst_20 : f32 to vector<8x1xf32>
      %30 = arith.addf %28, %29 : vector<8x1xf32>
      %31 = math.rsqrt %30 : vector<8x1xf32>
      %32 = vector.broadcast %21 : vector<8x1xf32> to vector<8x32xf32>
      %33 = arith.subf %17, %32 : vector<8x32xf32>
      %34 = vector.broadcast %31 : vector<8x1xf32> to vector<8x32xf32>
      %35 = arith.mulf %33, %34 : vector<8x32xf32>
      %c0_21 = arith.constant 0 : index
      %c0_22 = arith.constant 0 : index
      %36 = vector.load %arg6[%c0_21, %c0_22] : memref<1x32xf32, #tpu.memory_space<vmem>>, vector<1x32xf32>
      %37 = vector.broadcast %36 : vector<1x32xf32> to vector<8x32xf32>
      %38 = arith.mulf %35, %37 : vector<8x32xf32>
      %c0_23 = arith.constant 0 : index
      %c0_24 = arith.constant 0 : index
      %39 = vector.load %arg7[%c0_23, %c0_24] : memref<1x32xf32, #tpu.memory_space<vmem>>, vector<1x32xf32>
      %40 = vector.broadcast %39 : vector<1x32xf32> to vector<8x32xf32>
      %41 = arith.addf %38, %40 : vector<8x32xf32>
      %c0_25 = arith.constant 0 : index
      %c0_26 = arith.constant 0 : index
      %42 = vector.load %arg8[%c0_25, %c0_26] : memref<8x32xf32, #tpu.memory_space<vmem>>, vector<8x32xf32>
      tpu.vector_store %arg8[%c0_25, %c0_26], %41 {strides = array<i32>} : memref<8x32xf32, #tpu.memory_space<vmem>>, vector<8x32xf32>,
    } else {
    }
    return
  }
  func.func @transform_0(%arg0: i32, %arg1: i32) -> (i32, i32) {
    %c0_i32 = arith.constant 0 : i32
    return %arg0, %arg1 : i32, i32
  }
  func.func @transform_1(%arg0: i32, %arg1: i32) -> (i32, i32) {
    %c0_i32 = arith.constant 0 : i32
    %c0_i32_0 = arith.constant 0 : i32
    return %arg1, %c0_i32 : i32, i32
  }
  func.func @transform_2(%arg0: i32, %arg1: i32) -> (i32, i32) {
    %c0_i32 = arith.constant 0 : i32
    %c0_i32_0 = arith.constant 0 : i32
    %c0_i32_1 = arith.constant 0 : i32
    return %c0_i32, %c0_i32_0 : i32, i32
  }
  func.func @transform_3(%arg0: i32, %arg1: i32) -> (i32, i32) {
    %c0_i32 = arith.constant 0 : i32
    %c0_i32_0 = arith.constant 0 : i32
    return %arg0, %c0_i32 : i32, i32
  }
  func.func @transform_4(%arg0: i32, %arg1: i32) -> (i32, i32) {
    %c0_i32 = arith.constant 0 : i32
    %c0_i32_0 = arith.constant 0 : i32
    %c0_i32_1 = arith.constant 0 : i32
    return %c0_i32, %c0_i32_0 : i32, i32
  }
  func.func @transform_5(%arg0: i32, %arg1: i32) -> (i32, i32) {
    %c0_i32 = arith.constant 0 : i32
    %c0_i32_0 = arith.constant 0 : i32
    %c0_i32_1 = arith.constant 0 : i32
    return %c0_i32, %c0_i32_0 : i32, i32
  }
  func.func @transform_6(%arg0: i32, %arg1: i32) -> (i32, i32) {
    %c0_i32 = arith.constant 0 : i32
    %c0_i32_0 = arith.constant 0 : i32
    return %arg0, %c0_i32 : i32, i32
  }
}

module attributes {stable_mosaic.version = 11 : i64} {
  func.func @dense_res_ln_kernel(%arg0: i32, %arg1: i32, %arg2: memref<8x64xf32, #tpu.memory_space<vmem>>, %arg3: memref<64x32xf32, #tpu.memory_space<vmem>>, %arg4: memref<1x32xf32, #tpu.memory_space<vmem>>, %arg5: memref<8x32xf32, #tpu.memory_space<vmem>>, %arg6: memref<1x32xf32, #tpu.memory_space<vmem>>, %arg7: memref<1x32xf32, #tpu.memory_space<vmem>>, %arg8: memref<8x32xf32, #tpu.memory_space<vmem>>, %arg9: memref<8x32xf32, #tpu.memory_space<vmem>>) attributes {dimension_semantics = [#tpu.dimension_semantics<parallel>, #tpu.dimension_semantics<arbitrary>], iteration_bounds = array<i64: 2, 1>, scalar_prefetch = 0 : i64, scratch_operands = 1 : i64, tpu.core_type = #tpu.core_type<tc>, window_params = [{transform_indices = @transform_0, window_bounds = array<i64: 8, 64>}, {transform_indices = @transform_1, window_bounds = array<i64: 64, 32>}, {pipeline_mode = #tpu.pipeline_mode<synchronous>, transform_indices = @transform_2, window_bounds = array<i64: 1, 32>}, {transform_indices = @transform_3, window_bounds = array<i64: 8, 32>}, {pipeline_mode = #tpu.pipeline_mode<synchronous>, transform_indices = @transform_4, window_bounds = array<i64: 1, 32>}, {pipeline_mode = #tpu.pipeline_mode<synchronous>, transform_indices = @transform_5, window_bounds = array<i64: 1, 32>}, {transform_indices = @transform_6, window_bounds = array<i64: 8, 32>}]} {
    %c0_i32 = arith.constant 0 : i32
    %0 = arith.cmpi eq, %arg1, %c0_i32 : i32
    %1 = arith.extui %0 : i1 to i32
    %c0_i32_0 = arith.constant 0 : i32
    %2 = arith.cmpi ne, %1, %c0_i32_0 : i32
    scf.if %2 {
      %cst_10 = arith.constant 0.000000e+00 : f32
      %12 = vector.broadcast %cst_10 : f32 to vector<8x32xf32>
      %c0_11 = arith.constant 0 : index
      %c0_12 = arith.constant 0 : index
      %13 = vector.load %arg9[%c0_11, %c0_12] : memref<8x32xf32, #tpu.memory_space<vmem>>, vector<8x32xf32>
      tpu.vector_store %arg9[%c0_11, %c0_12], %12 {strides = array<i32>} : memref<8x32xf32, #tpu.memory_space<vmem>>, vector<8x32xf32>,
    } else {
    }
    %c0 = arith.constant 0 : index
    %c0_1 = arith.constant 0 : index
    %3 = vector.load %arg9[%c0, %c0_1] : memref<8x32xf32, #tpu.memory_space<vmem>>, vector<8x32xf32>
    %c0_2 = arith.constant 0 : index
    %c0_3 = arith.constant 0 : index
    %4 = vector.load %arg2[%c0_2, %c0_3] : memref<8x64xf32, #tpu.memory_space<vmem>>, vector<8x64xf32>
    %c0_4 = arith.constant 0 : index
    %c0_5 = arith.constant 0 : index
    %5 = vector.load %arg3[%c0_4, %c0_5] : memref<64x32xf32, #tpu.memory_space<vmem>>, vector<64x32xf32>
    %cst = arith.constant dense<0.000000e+00> : vector<8x32xf32>
    %6 = tpu.matmul %4, %5, %cst {dimension_numbers = #tpu.dot_dimension_numbers<[1], [0], [0], [1], [0, 0, 1, 1], [], []>} : vector<8x64xf32>, vector<64x32xf32>, vector<8x32xf32> -> vector<8x32xf32>
    %7 = arith.addf %3, %6 : vector<8x32xf32>
    %c0_6 = arith.constant 0 : index
    %c0_7 = arith.constant 0 : index
    %8 = vector.load %arg9[%c0_6, %c0_7] : memref<8x32xf32, #tpu.memory_space<vmem>>, vector<8x32xf32>
    tpu.vector_store %arg9[%c0_6, %c0_7], %7 {strides = array<i32>} : memref<8x32xf32, #tpu.memory_space<vmem>>, vector<8x32xf32>,
    %c0_i32_8 = arith.constant 0 : i32
    %9 = arith.cmpi eq, %arg1, %c0_i32_8 : i32
    %10 = arith.extui %9 : i1 to i32
    %c0_i32_9 = arith.constant 0 : i32
    %11 = arith.cmpi ne, %10, %c0_i32_9 : i32
    scf.if %11 {
      %c0_10 = arith.constant 0 : index
      %c0_11 = arith.constant 0 : index
      %12 = vector.load %arg9[%c0_10, %c0_11] : memref<8x32xf32, #tpu.memory_space<vmem>>, vector<8x32xf32>
      %c0_12 = arith.constant 0 : index
      %c0_13 = arith.constant 0 : index
      %13 = vector.load %arg4[%c0_12, %c0_13] : memref<1x32xf32, #tpu.memory_space<vmem>>, vector<1x32xf32>
      %14 = vector.broadcast %13 : vector<1x32xf32> to vector<8x32xf32>
      %15 = arith.addf %12, %14 : vector<8x32xf32>
      %c0_14 = arith.constant 0 : index
      %c0_15 = arith.constant 0 : index
      %16 = vector.load %arg5[%c0_14, %c0_15] : memref<8x32xf32, #tpu.memory_space<vmem>>, vector<8x32xf32>
      %17 = arith.addf %15, %16 : vector<8x32xf32>
      %cst_16 = arith.constant dense<0.000000e+00> : vector<8xf32>
      %18 = vector.multi_reduction <add>, %17, %cst_16 [1] : vector<8x32xf32> to vector<8xf32>
      %19 = vector.shape_cast %18 : vector<8xf32> to vector<8x1xf32>
      %cst_17 = arith.constant 3.200000e+01 : f32
      %20 = vector.broadcast %cst_17 : f32 to vector<8x1xf32>
      %21 = arith.divf %19, %20 : vector<8x1xf32>
      %22 = vector.broadcast %21 : vector<8x1xf32> to vector<8x32xf32>
      %23 = arith.subf %17, %22 : vector<8x32xf32>
      %24 = arith.mulf %23, %23 : vector<8x32xf32>
      %cst_18 = arith.constant dense<0.000000e+00> : vector<8xf32>
      %25 = vector.multi_reduction <add>, %24, %cst_18 [1] : vector<8x32xf32> to vector<8xf32>
      %26 = vector.shape_cast %25 : vector<8xf32> to vector<8x1xf32>
      %cst_19 = arith.constant 3.200000e+01 : f32
      %27 = vector.broadcast %cst_19 : f32 to vector<8x1xf32>
      %28 = arith.divf %26, %27 : vector<8x1xf32>
      %cst_20 = arith.constant 9.99999996E-13 : f32
      %29 = vector.broadcast %cst_20 : f32 to vector<8x1xf32>
      %30 = arith.addf %28, %29 : vector<8x1xf32>
      %31 = math.rsqrt %30 : vector<8x1xf32>
      %32 = vector.broadcast %21 : vector<8x1xf32> to vector<8x32xf32>
      %33 = arith.subf %17, %32 : vector<8x32xf32>
      %34 = vector.broadcast %31 : vector<8x1xf32> to vector<8x32xf32>
      %35 = arith.mulf %33, %34 : vector<8x32xf32>
      %c0_21 = arith.constant 0 : index
      %c0_22 = arith.constant 0 : index
      %36 = vector.load %arg6[%c0_21, %c0_22] : memref<1x32xf32, #tpu.memory_space<vmem>>, vector<1x32xf32>
      %37 = vector.broadcast %36 : vector<1x32xf32> to vector<8x32xf32>
      %38 = arith.mulf %35, %37 : vector<8x32xf32>
      %c0_23 = arith.constant 0 : index
      %c0_24 = arith.constant 0 : index
      %39 = vector.load %arg7[%c0_23, %c0_24] : memref<1x32xf32, #tpu.memory_space<vmem>>, vector<1x32xf32>
      %40 = vector.broadcast %39 : vector<1x32xf32> to vector<8x32xf32>
      %41 = arith.addf %38, %40 : vector<8x32xf32>
      %c0_25 = arith.constant 0 : index
      %c0_26 = arith.constant 0 : index
      %42 = vector.load %arg8[%c0_25, %c0_26] : memref<8x32xf32, #tpu.memory_space<vmem>>, vector<8x32xf32>
      tpu.vector_store %arg8[%c0_25, %c0_26], %41 {strides = array<i32>} : memref<8x32xf32, #tpu.memory_space<vmem>>, vector<8x32xf32>,
    } else {
    }
    return
  }
  func.func @transform_0(%arg0: i32, %arg1: i32) -> (i32, i32) {
    %c0_i32 = arith.constant 0 : i32
    return %arg0, %arg1 : i32, i32
  }
  func.func @transform_1(%arg0: i32, %arg1: i32) -> (i32, i32) {
    %c0_i32 = arith.constant 0 : i32
    %c0_i32_0 = arith.constant 0 : i32
    return %arg1, %c0_i32 : i32, i32
  }
  func.func @transform_2(%arg0: i32, %arg1: i32) -> (i32, i32) {
    %c0_i32 = arith.constant 0 : i32
    %c0_i32_0 = arith.constant 0 : i32
    %c0_i32_1 = arith.constant 0 : i32
    return %c0_i32, %c0_i32_0 : i32, i32
  }
  func.func @transform_3(%arg0: i32, %arg1: i32) -> (i32, i32) {
    %c0_i32 = arith.constant 0 : i32
    %c0_i32_0 = arith.constant 0 : i32
    return %arg0, %c0_i32 : i32, i32
  }
  func.func @transform_4(%arg0: i32, %arg1: i32) -> (i32, i32) {
    %c0_i32 = arith.constant 0 : i32
    %c0_i32_0 = arith.constant 0 : i32
    %c0_i32_1 = arith.constant 0 : i32
    return %c0_i32, %c0_i32_0 : i32, i32
  }
  func.func @transform_5(%arg0: i32, %arg1: i32) -> (i32, i32) {
    %c0_i32 = arith.constant 0 : i32
    %c0_i32_0 = arith.constant 0 : i32
    %c0_i32_1 = arith.constant 0 : i32
    return %c0_i32, %c0_i32_0 : i32, i32
  }
  func.func @transform_6(%arg0: i32, %arg1: i32) -> (i32, i32) {
    %c0_i32 = arith.constant 0 : i32
    %c0_i32_0 = arith.constant 0 : i32
    return %arg0, %c0_i32 : i32, i32
  }
}

</mosaic_0001>

<bundles_post_ra>
// kernel: basemodel_forward.11
= control target key start
LH: loop header
LB: loop body
LE: loop exit
PB: predicated region body
PF: predicated region fallthrough
CT: control target
= control target key end

     0   :  { %s301_s12 = smov 0   ;;  %s327_s0 = inlined_call_operand.vmem [shape: f32[16,32], index: 0, kind: input, shape index: {}]   ;;  %s328_s1 = inlined_call_operand.vmem [shape: f32[1,32], index: 1, kind: input, shape index: {}]   ;;  %s329_s2 = inlined_call_operand.vmem [shape: f32[1,32], index: 2, kind: input, shape index: {}]   ;;  %s330_s3 = inlined_call_operand.vmem [shape: f32[16,32], index: 3, kind: output, shape index: {}]  }
   0x1 LB: > { %s252_s13 = sadd.s32 4294967295, %s279_s12   ;;  %p256_p0 = scmp.ge.s32.totalorder %s279_s12, 1  ;;  %s279_s12 = sphi %s301_s12, %s13_s12  }
   0x2   : > { %p136_p1 = scmp.lt.s32.totalorder %s279_s12, 3 }
   0x4   : > { %p137_p2 = pnand %p256_p0, %p136_p1 }
   0x5   : > { %p158_p3 = scmp.lt.s32.totalorder (!%p137_p2), %s252_s13, 1  ;;  %vm167_vm0 = vcmask (!%p137_p2), 261120   ;;  %v259_v11 = vld [vmem:[%s328_s1] ss:$0 sm:$0xff] (!%p137_p2) }
   0x6   : > { %140 = sbr.rel (%p137_p2) target bundleno = 331 (0x14b), region = 32  ;;  %v260_v13 = vld [vmem:[%s329_s2] ss:$0 sm:$0xff] (!%p137_p2) }
   0xd   : > { %s332_s13 = smov (!%p158_p3, %s252_s13), 1 }
   0xe   : > { %s257_s14 = sshll.u32 %s332_s13, 3 }
   0xf   : > { %s161_s17 = scalar_lea.vmem %s327_s0, %s257_s14  ;;  %s165_s24 = scalar_lea.vmem %s330_s3, %s257_s14 }
  0x10   : > { %v166_v0 = vld [vmem:[%s161_s17] sm:$0xff] }
  0x11   : > { %v168_v1 = vsel %vm167_vm0, %v166_v0, 0.0 }
  0x12   : > { %169 = vadd.xlane.f32.xlu0 %v168_v1 }
  0x9f   : > { %v170_v2 = vpop.xlane.xlu0 %169 }
  0xa0   : > { %v172_v3 = vmul.f32 0.03125, %v170_v2 }
  0xa2   : > { %v173_v4 = vsub.f32 %v166_v0, %v172_v3 }
  0xa4   : > { %v174_v5 = vmul.f32 %v173_v4, %v173_v4 }
  0xa6   : > { %v175_v6 = vsel %vm167_vm0, %v174_v5, 0.0 }
  0xa7   : > { %176 = vadd.xlane.f32.xlu0 %v175_v6 }
 0x134   : > { %v177_v7 = vpop.xlane.xlu0 %176 }
 0x135   : > { %v178_v8 = vmul.f32 0.03125, %v177_v7 }
 0x137   : > { %v179_v9 = vadd.f32 1e-12, %v178_v8 }
 0x139   : > { %271 = vrsqrt.f32 %v179_v9 }
 0x143   : > { %v272_v10 = vpop.eup %271 }
 0x144   : > { %v181_v12 = vmul.f32 %v272_v10, %v173_v4 }
 0x146   : > { %v189_v14 = vmul.f32 %v259_v11, %v181_v12 }
 0x148   : > { %v197_v15 = vadd.f32 %v260_v13, %v189_v14 }
 0x14a   : > { %198 = vst.msk [vmem:[%s165_s24] sm:$0xff] %vm167_vm0, %v197_v15 }
 0x14b PF: > { %s13_s12 = sadd.s32 1, %s279_s12  }
 0x14c   : > { %p10_p4 = scmp.ge.s32.totalorder %s13_s12, 4  }
 0x14e   :  { %12 = sbr.rel (!%p10_p4) target bundleno = 1 (0x1), region = 62 }

// kernel: basemodel_forward.14
= control target key start
LH: loop header
LB: loop body
LE: loop exit
PB: predicated region body
PF: predicated region fallthrough
CT: control target
= control target key end

     0   :  { %s662_s21 = smov 0   ;;  %s664_s22 = smov 0   ;;  %s730_s0 = inlined_call_operand.vmem [shape: f32[16,32], index: 0, kind: input, shape index: {}]   ;;  %s731_s1 = inlined_call_operand.vmem [shape: f32[32,32], index: 1, kind: input, shape index: {}]   ;;  %s732_s2 = inlined_call_operand.vmem [shape: f32[1,32], index: 2, kind: input, shape index: {}]   ;;  %s733_s3 = inlined_call_operand.vmem [shape: f32[16,32], index: 3, kind: input, shape index: {}]   ;;  %s734_s4 = inlined_call_operand.vmem [shape: f32[1,32], index: 4, kind: input, shape index: {}]   ;;  %s735_s5 = inlined_call_operand.vmem [shape: f32[1,32], index: 5, kind: input, shape index: {}]   ;;  %s736_s6 = inlined_call_operand.vmem [shape: f32[16,32], index: 6, kind: output, shape index: {}]  }
   0x1   :  { %s666_s23 = smov 0  }
   0x2 LB: > { %s28_s24 = sadd.s32 1, %s618_s22  ;;  %p539_p0 = scmp.ge.s32.totalorder %s622_s23, 1  ;;  %s622_s23 = sphi %s666_s23, %s16_s23   ;;  %s618_s22 = sphi %s664_s22, %s738_s22   ;;  %s614_s21 = sphi %s662_s21, %s737_s21  }
   0x3   : > { %p30_p1 = scmp.ge.s32.totalorder %s28_s24, 2  ;;  %p248_p2 = scmp.lt.s32.totalorder %s622_s23, 3 }
   0x5   : > { %s740_s24 = smov (%p30_p1, %s28_s24), 0  ;;  %p249_p3 = pnand %p539_p0, %p248_p2 }
   0x6   : > { %v317_v0 = vld [vmem:[%s731_s1] sm:$0xff] (!%p249_p3)  ;;  %v318_v1 = vld [vmem:[%s731_s1 + $0x8] sm:$0xff] (!%p249_p3)  ;;  %v319_v2 = vld [vmem:[%s731_s1 + $0x10] sm:$0xff] (!%p249_p3)  ;;  %vm313_vm0 = vcmask (!%p249_p3), 261120   ;;  %v624_v3 = vmov (!%p249_p3), 0.0|0.0   ;;  %v625_v6 = vmov (!%p249_p3), 0.0  }
   0x7   : > { %252 = sbr.rel (%p249_p3) target bundleno = 558 (0x22e), region = 44  ;;  %565 = vmatprep.subr.bf16.mxu0 (!%p249_p3), %v624_v3  ;;  %v566_v4 = vpack.c.bf16 (!%p249_p3), %v318_v1, %v317_v0  ;;  %v320_v5 = vld [vmem:[%s731_s1 + $0x18] sm:$0xff] (!%p249_p3)  ;;  %314 = vst.msk [vmem:[#allocation2] sm:$0xff] (!%p249_p3), %vm313_vm0, %v625_v6  ;;  %p288_p4 = scmp.lt.s32.totalorder (!%p249_p3), %s614_s21, 1  ;;  %vm626_vm1 = vmmov (!%p249_p3), 0  }
   0x8   : > { %562 = vmatprep.mubr.msk.f32.mxu0 (!%p249_p3), %vm626_vm1, %v625_v6  ;;  %v569_v7 = vpack.c.bf16 (!%p249_p3), %v320_v5, %v319_v2  ;;  %v544_v13 = vld [vmem:[%s732_s2] ss:$0 sm:$0xff] (!%p249_p3) }
   0x9   : > { %567 = vmatpush3.bf16.msra.mxu0 (!%p249_p3), %v566_v4  ;;  %v545_v28 = vld [vmem:[%s734_s4] ss:$0 sm:$0xff] (!%p249_p3) }
   0xa   : > { %568 = vmatprep.subr.bf16.mxu0 (!%p249_p3), %v624_v3  ;;  %v546_v30 = vld [vmem:[%s735_s5] ss:$0 sm:$0xff] (!%p249_p3) }
   0xd   : > { %570 = vmatpush3.bf16.msra.mxu0 (!%p249_p3), %v569_v7 }
   0xe   : > { %s742_s21 = smov (!%p288_p4, %s614_s21), 1  ;;  %v315_v9 = vld [vmem:[#allocation2] sm:$0xff] }
   0xf   : > { %s693_s9 = sshll.u32 %s742_s21, 3 }
  0x10   : > { %s294_s12 = scalar_lea.vmem %s730_s0, %s693_s9  ;;  %s304_s15 = scalar_lea.vmem %s733_s3, %s693_s9 }
  0x11   : > { %v316_v8 = vld [vmem:[%s294_s12] sm:$0xff]  ;;  %s308_s27 = scalar_lea.vmem %s736_s6, %s693_s9 }
  0x12   : > { %563 = vmatmul.mubr.msk.f32.vlgmr.msra.gmra.mrb[0].mxu0 %vm313_vm0, %v316_v8  ;;  %v409_v15 = vld [vmem:[%s304_s15] sm:$0xff] }
  0xe5   : > { %v391_v10 = vpop.f32.mrb[0].mxu0 }
  0xe6   : > { %v395_v11 = vadd.f32 %v391_v10, %v315_v9  ;;  %v564_v12 = vpop.f32.mrb[1].mxu0 }
  0xe8   : > { %396 = vst.msk [vmem:[#allocation2] sm:$0xff] %vm313_vm0, %v395_v11 }
  0xef   : > { %v400_v14 = vld [vmem:[#allocation2] sm:$0xff] }
  0xf0   : > { %v408_v16 = vadd.f32 %v544_v13, %v400_v14 }
  0xf2   : > { %v410_v17 = vadd.f32 %v409_v15, %v408_v16 }
  0xf4   : > { %v411_v18 = vsel %vm313_vm0, %v410_v17, 0.0 }
  0xf5   : > { %412 = vadd.xlane.f32.xlu0 %v411_v18 }
 0x182   : > { %v413_v19 = vpop.xlane.xlu0 %412 }
 0x183   : > { %v415_v20 = vmul.f32 0.03125, %v413_v19 }
 0x185   : > { %v416_v21 = vsub.f32 %v410_v17, %v415_v20 }
 0x187   : > { %v417_v22 = vmul.f32 %v416_v21, %v416_v21 }
 0x189   : > { %v418_v23 = vsel %vm313_vm0, %v417_v22, 0.0 }
 0x18a   : > { %419 = vadd.xlane.f32.xlu0 %v418_v23 }
 0x217   : > { %v420_v24 = vpop.xlane.xlu0 %419 }
 0x218   : > { %v421_v25 = vmul.f32 0.03125, %v420_v24 }
 0x21a   : > { %v422_v26 = vadd.f32 1e-12, %v421_v25 }
 0x21c   : > { %598 = vrsqrt.f32 %v422_v26 }
 0x226   : > { %v599_v27 = vpop.eup %598 }
 0x227   : > { %v424_v29 = vmul.f32 %v599_v27, %v416_v21 }
 0x229   : > { %v432_v31 = vmul.f32 %v545_v28, %v424_v29 }
 0x22b   : > { %v440_v32 = vadd.f32 %v546_v30, %v432_v31 }
 0x22d   : > { %441 = vst.msk [vmem:[%s308_s27] sm:$0xff] %vm313_vm0, %v440_v32 }
 0x22e PF: > { %s16_s23 = sadd.s32 1, %s622_s23   ;;  %s737_s21 = smov %s618_s22 }
 0x22f   : > { %p13_p5 = scmp.ge.s32.totalorder %s16_s23, 4   ;;  %s738_s22 = smov %s740_s24 }
 0x231   :  { %15 = sbr.rel (!%p13_p5) target bundleno = 2 (0x2), region = 88 }

// kernel: basemodel_forward.12
= control target key start
LH: loop header
LB: loop body
LE: loop exit
PB: predicated region body
PF: predicated region fallthrough
CT: control target
= control target key end

     0   :  { %s501_s12 = smov 0   ;;  %s503_s13 = smov 0   ;;  %s552_s0 = inlined_call_operand.vmem [shape: f32[16,32], index: 0, kind: input, shape index: {}]   ;;  %s553_s1 = inlined_call_operand.vmem [shape: f32[32,96], index: 1, kind: input, shape index: {}]   ;;  %s554_s2 = inlined_call_operand.vmem [shape: f32[1,96], index: 2, kind: input, shape index: {}]   ;;  %s555_s3 = inlined_call_operand.vmem [shape: f32[16,96], index: 3, kind: output, shape index: {}]  }
   0x1   :  { %s505_s14 = smov 0  }
   0x2 LB: > { %s25_s15 = sadd.s32 1, %s472_s13  ;;  %p398_p0 = scmp.ge.s32.totalorder %s476_s14, 1  ;;  %s476_s14 = sphi %s505_s14, %s13_s14   ;;  %s472_s13 = sphi %s503_s13, %s557_s13   ;;  %s468_s12 = sphi %s501_s12, %s556_s12  }
   0x3   : > { %p27_p1 = scmp.ge.s32.totalorder %s25_s15, 2  ;;  %p164_p2 = scmp.lt.s32.totalorder %s476_s14, 3 }
   0x5   : > { %s559_s15 = smov (%p27_p1, %s25_s15), 0  ;;  %p165_p3 = pnand %p398_p0, %p164_p2 }
   0x6   : > { %v219_v0 = vld [vmem:[%s553_s1] sm:$0xff] (!%p165_p3)  ;;  %v220_v1 = vld [vmem:[%s553_s1 + $0x8] sm:$0xff] (!%p165_p3)  ;;  %v221_v2 = vld [vmem:[%s553_s1 + $0x10] sm:$0xff] (!%p165_p3)  ;;  %vm215_vm0 = vcmask (!%p165_p3), 785408   ;;  %v478_v3 = vmov (!%p165_p3), 0.0|0.0   ;;  %v479_v6 = vmov (!%p165_p3), 0.0  }
   0x7   : > { %168 = sbr.rel (%p165_p3) target bundleno = 243 (0xf3), region = 32  ;;  %421 = vmatprep.subr.bf16.mxu0 (!%p165_p3), %v478_v3  ;;  %v422_v4 = vpack.c.bf16 (!%p165_p3), %v220_v1, %v219_v0  ;;  %v222_v5 = vld [vmem:[%s553_s1 + $0x18] sm:$0xff] (!%p165_p3)  ;;  %216 = vst.msk [vmem:[#allocation2] sm:$0xff] (!%p165_p3), %vm215_vm0, %v479_v6  ;;  %p194_p4 = scmp.lt.s32.totalorder (!%p165_p3), %s468_s12, 1  ;;  %vm480_vm1 = vmmov (!%p165_p3), 0   ;;  %vm223_vm2 = vcmask (!%p165_p3), 261120  }
   0x8   : > { %418 = vmatprep.mubr.msk.f32.mxu0 (!%p165_p3), %vm480_vm1, %v479_v6  ;;  %v425_v7 = vpack.c.bf16 (!%p165_p3), %v222_v5, %v221_v2  ;;  %v402_v13 = vld [vmem:[%s554_s2] ss:$0 sm:$0xff] (!%p165_p3) }
   0x9   : > { %423 = vmatpush3.bf16.msra.mxu0 (!%p165_p3), %v422_v4 }
   0xa   : > { %424 = vmatprep.subr.bf16.mxu0 (!%p165_p3), %v478_v3 }
   0xd   : > { %426 = vmatpush3.bf16.msra.mxu0 (!%p165_p3), %v425_v7 }
   0xe   : > { %s561_s12 = smov (!%p194_p4, %s468_s12), 1  ;;  %v217_v9 = vld [vmem:[#allocation2] sm:$0xff] }
   0xf   : > { %s399_s24 = sshll.u32 %s561_s12, 3 }
  0x10   : > { %s200_s27 = scalar_lea.vmem %s552_s0, %s399_s24  ;;  %s210_s5 = scalar_lea.vmem %s555_s3, %s399_s24 }
  0x11   : > { %v218_v8 = vld [vmem:[%s200_s27] sm:$0xff] }
  0x12   : > { %419 = vmatmul.mubr.msk.f32.vlgmr.msra.gmra.mrb[0].mxu0 %vm223_vm2, %v218_v8 }
  0xe5   : > { %v293_v10 = vpop.f32.mrb[0].mxu0 }
  0xe6   : > { %v297_v11 = vadd.f32 %v293_v10, %v217_v9  ;;  %v420_v12 = vpop.f32.mrb[1].mxu0 }
  0xe8   : > { %299 = vst.msk [vmem:[#allocation2] sm:$0xff] %vm215_vm0, %v297_v11 }
  0xef   : > { %v303_v14 = vld [vmem:[#allocation2] sm:$0xff] }
  0xf0   : > { %v311_v15 = vadd.f32 %v402_v13, %v303_v14 }
  0xf2   : > { %312 = vst.msk [vmem:[%s210_s5] sm:$0xff] %vm215_vm0, %v311_v15 }
  0xf3 PF: > { %s13_s14 = sadd.s32 1, %s476_s14   ;;  %s556_s12 = smov %s472_s13 }
  0xf4   : > { %p10_p5 = scmp.ge.s32.totalorder %s13_s14, 4   ;;  %s557_s13 = smov %s559_s15 }
  0xf6   :  { %12 = sbr.rel (!%p10_p5) target bundleno = 2 (0x2), region = 73 }

// kernel: basemodel_forward.13
= control target key start
LH: loop header
LB: loop body
LE: loop exit
PB: predicated region body
PF: predicated region fallthrough
CT: control target
= control target key end

     0   :  { %s665_s9 = smov 0   ;;  %s716_s0 = inlined_call_operand.vmem [shape: f32[2,8,96], index: 0, kind: input, shape index: {}]   ;;  %s717_s1 = inlined_call_operand.vmem [shape: f32[2,1,8], index: 1, kind: input, shape index: {}]   ;;  %s718_s2 = inlined_call_operand.vmem [shape: f32[2,8,32], index: 2, kind: output, shape index: {}]  }
   0x1 LB: > { %s567_s10 = sadd.s32 4294967295, %s640_s9   ;;  %p571_p0 = scmp.ge.s32.totalorder %s640_s9, 1  ;;  %s640_s9 = sphi %s665_s9, %s12_s9  }
   0x2   : > { %p119_p1 = scmp.lt.s32.totalorder %s640_s9, 3 }
   0x4   : > { %p120_p2 = pnand %p571_p0, %p119_p1 }
   0x5   : > { %p142_p3 = scmp.lt.s32.totalorder (!%p120_p2), %s567_s10, 1  ;;  %v642_v0 = vmov (!%p120_p2), 0.0   ;;  %vm643_vm0 = vmmov (!%p120_p2), 0   ;;  %s644_s15 = smov (!%p120_p2), 96   ;;  %vm160_vm1 = vcmask (!%p120_p2), 130048   ;;  %v237_v3 = vlaneseq (!%p120_p2) }
   0x6   : > { %123 = sbr.rel (%p120_p2) target bundleno = 1528 (0x5f8), region = 28  ;;  %590 = vmatprep.subr.mxu0 (!%p120_p2), %v642_v0  ;;  %592 = vmatprep.mubr.msk.f32.mxu0 (!%p120_p2), %vm643_vm0, %v642_v0  ;;  %s645_s16 = smov (!%p120_p2), 64   ;;  %vm243_vm2 = vcmask (!%p120_p2), 64512   ;;  %vm503_vm3 = vcmask (!%p120_p2), 261120  }
   0x7   : > { %595 = vmatprep.subr.mxu1 (!%p120_p2), %v642_v0  ;;  %597 = vmatprep.mubr.msk.f32.mxu1 (!%p120_p2), %vm643_vm0, %v642_v0  ;;  %s646_s17 = smov (!%p120_p2), 80   ;;  %v238_v6 = vshrl.u32 (!%p120_p2), %v237_v3, 7  ;;  %s647_s21 = smov (!%p120_p2), 112  }
   0x8   : > { %s648_s22 = smov (!%p120_p2), 48   ;;  %s649_s23 = smov (!%p120_p2), 16  }
   0x9   : > { %v239_v8 = vsub.s32 (!%p120_p2), 0, %v238_v6 }
   0xd   : > { %s720_s10 = smov (!%p142_p3, %s567_s10), 1 }
   0xe   : > { %s572_s11 = sshll.u32 %s720_s10, 3  ;;  %s148_s20 = scalar_lea.vmem %s717_s1, %s720_s10 }
   0xf   : > { %s145_s14 = scalar_lea.vmem %s716_s0, %s572_s11  ;;  %v153_v4 = vld [vmem:[%s148_s20] sm:$0x1]  ;;  %s152_s26 = scalar_lea.vmem %s718_s2, %s572_s11 }
  0x10   : > { %v683_v1 = vld [vmem:[%s145_s14] sm:$0xff]  ;;  %v154_v5 = vsub.f32 1.0, %v153_v4 }
  0x11   : > { %158 = vrot.lane.b32.xlu0 %v683_v1, %s644_s15  ;;  %255 = vrot.lane.b32.xlu1 %v683_v1, %s645_s16 }
  0x12   : > { %v155_v7 = vmul.f32 -1e+09, %v154_v5 }
  0x14   : > { %v240_v9 = vrot.slane %v155_v7, %v239_v8 }
  0x15   : > { %333 = vrot.lane.b32.xlu1 %v683_v1, %s646_s17 }
  0x83   : > { %v159_v2 = vpop.permute.xlu0 %158  ;;  %v256_v15 = vpop.permute.xlu1 %255 }
  0x84   : > { %591 = vmatpush3.xpose.msk.msra.mxu0 %vm160_vm1, %v159_v2  ;;  %596 = vmatpush3.msra.mxu1 %v256_v15 }
  0x85   : > { %605 = vmatprep.subr.mxu0 %v642_v0  ;;  %600 = vmatprep.subr.mxu1 %v642_v0 }
  0x87   : > { %593 = vmatmul.mubr.msk.f32.vlgmr.msra.gmra.mrb[0].mxu0 %vm160_vm1, %v683_v1  ;;  %v334_v21 = vpop.permute.xlu1 %333 }
  0x88   : > { %607 = vmatprep.mubr.msk.f32.mxu0 %vm643_vm0, %v642_v0 }
 0x15a   : > { %v231_v10 = vpop.f32.mrb[0].mxu0 }
 0x15b   : > { %v235_v11 = vmul.f32 0.25, %v231_v10  ;;  %v594_v12 = vpop.f32.mrb[1].mxu0 }
 0x15d   : > { %v242_v13 = vadd.f32 %v240_v9, %v235_v11 }
 0x15f   : > { %v244_v14 = vsel %vm243_vm2, %v242_v13, -inf }
 0x160   : > { %245 = vmax.xlane.f32.xlu0 %v244_v14 }
 0x1ed   : > { %v246_v16 = vpop.xlane.xlu0 %245 }
 0x1ee   : > { %v247_v17 = vsub.f32 %v242_v13, %v246_v16 }
 0x1f0   : > { %v248_v18 = vmul.f32 1.442695, %v247_v17 }
 0x1f2   : > { %626 = vpow2.f32 %v248_v18 }
 0x1fc   : > { %v627_v19 = vpop.eup %626 }
 0x1fd   : > { %v250_v20 = vsel %vm243_vm2, %v627_v19, 0.0 }
 0x1fe   : > { %251 = vadd.xlane.f32.xlu1 %v250_v20 }
 0x20f   : > { %331 = vrot.lane.b32.xlu1 %v683_v1, %s647_s21 }
 0x28b   : > { %v252_v22 = vpop.xlane.xlu1 %251 }
 0x28c   : > { %628 = vrcp.f32 %v252_v22 }
 0x28f   : > { %v332_v25 = vpop.permute.xlu1 %331 }
 0x296   : > { %v629_v23 = vpop.eup %628 }
 0x297   : > { %v254_v24 = vmul.f32 %v629_v23, %v627_v19 }
 0x299   : > { %598 = vmatmul.mubr.msk.f32.vlgmr.msra.gmra.mrb[0].mxu1 %vm243_vm2, %v254_v24 }
 0x29a   : > { %601 = vmatpush3.xpose.msk.msra.mxu1 %vm160_vm1, %v334_v21  ;;  %602 = vmatprep.mubr.msk.f32.mxu1 %vm643_vm0, %v642_v0 }
 0x29d   : > { %603 = vmatmul.mubr.msk.f32.vlgmr.msra.gmra.mrb[2].mxu1 %vm160_vm1, %v332_v25 }
 0x36c   : > { %v327_v26 = vpop.f32.mrb[0].mxu1 }
 0x36d   : > { %v599_v27 = vpop.f32.mrb[1].mxu1 }
 0x370   : > { %v405_v28 = vpop.f32.mrb[2].mxu1 }
 0x371   : > { %v409_v29 = vmul.f32 0.25, %v405_v28  ;;  %v604_v30 = vpop.f32.mrb[3].mxu1 }
 0x373   : > { %v410_v31 = vadd.f32 %v409_v29, %v240_v9 }
 0x375   : > { %v411_v32 = vsel %vm243_vm2, %v410_v31, -inf }
 0x376   : > { %412 = vmax.xlane.f32.xlu1 %v411_v32 }
 0x403   : > { %v413_v33 = vpop.xlane.xlu1 %412 }
 0x404   : > { %v414_v34 = vsub.f32 %v410_v31, %v413_v33 }
 0x406   : > { %v415_v35 = vmul.f32 1.442695, %v414_v34 }
 0x408   : > { %630 = vpow2.f32 %v415_v35 }
 0x412   : > { %v631_v36 = vpop.eup %630 }
 0x413   : > { %v417_v37 = vsel %vm243_vm2, %v631_v36, 0.0 }
 0x414   : > { %418 = vadd.xlane.f32.xlu0 %v417_v37 }
 0x42a   : > { %422 = vrot.lane.b32.xlu0 %v683_v1, %s648_s22 }
 0x4a1   : > { %v419_v38 = vpop.xlane.xlu0 %418 }
 0x4a2   : > { %632 = vrcp.f32 %v419_v38 }
 0x4a5   : > { %v423_v39 = vpop.permute.xlu0 %422 }
 0x4a6   : > { %606 = vmatpush3.msra.mxu0 %v423_v39 }
 0x4ac   : > { %v633_v40 = vpop.eup %632 }
 0x4ad   : > { %v421_v41 = vmul.f32 %v633_v40, %v631_v36 }
 0x4af   : > { %608 = vmatmul.mubr.msk.f32.vlgmr.msra.gmra.mrb[2].mxu0 %vm243_vm2, %v421_v41 }
 0x582   : > { %v494_v42 = vpop.f32.mrb[2].mxu0 }
 0x583   : > { %499 = vrot.lane.b32.xlu0 %v494_v42, %s649_s23  ;;  %v609_v43 = vpop.f32.mrb[3].mxu0 }
 0x5f5   : > { %v500_v44 = vpop.permute.xlu0 %499 }
 0x5f6   : > { %v502_v45 = vsel %vm160_vm1, %v327_v26, %v500_v44 }
 0x5f7   : > { %504 = vst.msk [vmem:[%s152_s26] sm:$0xff] %vm503_vm3, %v502_v45 }
 0x5f8 PF: > { %s12_s9 = sadd.s32 1, %s640_s9  }
 0x5f9   : > { %p9_p4 = scmp.ge.s32.totalorder %s12_s9, 4  }
 0x5fb   :  { %11 = sbr.rel (!%p9_p4) target bundleno = 1 (0x1), region = 61 }

// kernel: basemodel_forward.15
= control target key start
LH: loop header
LB: loop body
LE: loop exit
PB: predicated region body
PF: predicated region fallthrough
CT: control target
= control target key end

     0   :  { %s512_s12 = smov 0   ;;  %s514_s13 = smov 0   ;;  %s563_s0 = inlined_call_operand.vmem [shape: f32[16,32], index: 0, kind: input, shape index: {}]   ;;  %s564_s1 = inlined_call_operand.vmem [shape: f32[32,64], index: 1, kind: input, shape index: {}]   ;;  %s565_s2 = inlined_call_operand.vmem [shape: f32[1,64], index: 2, kind: input, shape index: {}]   ;;  %s566_s3 = inlined_call_operand.vmem [shape: f32[16,64], index: 3, kind: output, shape index: {}]  }
   0x1   :  { %s516_s14 = smov 0  }
   0x2 LB: > { %s25_s15 = sadd.s32 1, %s483_s13  ;;  %p407_p0 = scmp.ge.s32.totalorder %s487_s14, 1  ;;  %s487_s14 = sphi %s516_s14, %s13_s14   ;;  %s483_s13 = sphi %s514_s13, %s568_s13   ;;  %s479_s12 = sphi %s512_s12, %s567_s12  }
   0x3   : > { %p27_p1 = scmp.ge.s32.totalorder %s25_s15, 2  ;;  %p164_p2 = scmp.lt.s32.totalorder %s487_s14, 3 }
   0x5   : > { %s570_s15 = smov (%p27_p1, %s25_s15), 0  ;;  %p165_p3 = pnand %p407_p0, %p164_p2 }
   0x6   : > { %v219_v0 = vld [vmem:[%s564_s1] sm:$0xff] (!%p165_p3)  ;;  %v220_v1 = vld [vmem:[%s564_s1 + $0x8] sm:$0xff] (!%p165_p3)  ;;  %v221_v2 = vld [vmem:[%s564_s1 + $0x10] sm:$0xff] (!%p165_p3)  ;;  %vm215_vm0 = vcmask (!%p165_p3), 523264   ;;  %v489_v3 = vmov (!%p165_p3), 0.0|0.0   ;;  %v490_v6 = vmov (!%p165_p3), 0.0  }
   0x7   : > { %168 = sbr.rel (%p165_p3) target bundleno = 268 (0x10c), region = 32  ;;  %430 = vmatprep.subr.bf16.mxu0 (!%p165_p3), %v489_v3  ;;  %v431_v4 = vpack.c.bf16 (!%p165_p3), %v220_v1, %v219_v0  ;;  %v222_v5 = vld [vmem:[%s564_s1 + $0x18] sm:$0xff] (!%p165_p3)  ;;  %216 = vst.msk [vmem:[#allocation2] sm:$0xff] (!%p165_p3), %vm215_vm0, %v490_v6  ;;  %p194_p4 = scmp.lt.s32.totalorder (!%p165_p3), %s479_s12, 1  ;;  %vm491_vm1 = vmmov (!%p165_p3), 0   ;;  %vm223_vm2 = vcmask (!%p165_p3), 261120  }
   0x8   : > { %427 = vmatprep.mubr.msk.f32.mxu0 (!%p165_p3), %vm491_vm1, %v490_v6  ;;  %v434_v7 = vpack.c.bf16 (!%p165_p3), %v222_v5, %v221_v2  ;;  %v411_v13 = vld [vmem:[%s565_s2] ss:$0 sm:$0xff] (!%p165_p3) }
   0x9   : > { %432 = vmatpush3.bf16.msra.mxu0 (!%p165_p3), %v431_v4 }
   0xa   : > { %433 = vmatprep.subr.bf16.mxu0 (!%p165_p3), %v489_v3 }
   0xd   : > { %435 = vmatpush3.bf16.msra.mxu0 (!%p165_p3), %v434_v7 }
   0xe   : > { %s572_s12 = smov (!%p194_p4, %s479_s12), 1  ;;  %v217_v9 = vld [vmem:[#allocation2] sm:$0xff] }
   0xf   : > { %s408_s24 = sshll.u32 %s572_s12, 3 }
  0x10   : > { %s200_s27 = scalar_lea.vmem %s563_s0, %s408_s24  ;;  %s210_s5 = scalar_lea.vmem %s566_s3, %s408_s24 }
  0x11   : > { %v218_v8 = vld [vmem:[%s200_s27] sm:$0xff] }
  0x12   : > { %428 = vmatmul.mubr.msk.f32.vlgmr.msra.gmra.mrb[0].mxu0 %vm223_vm2, %v218_v8 }
  0xe5   : > { %v293_v10 = vpop.f32.mrb[0].mxu0 }
  0xe6   : > { %v297_v11 = vadd.f32 %v293_v10, %v217_v9  ;;  %v429_v12 = vpop.f32.mrb[1].mxu0 }
  0xe8   : > { %299 = vst.msk [vmem:[#allocation2] sm:$0xff] %vm215_vm0, %v297_v11 }
  0xef   : > { %v303_v14 = vld [vmem:[#allocation2] sm:$0xff] }
  0xf0   : > { %v311_v15 = vadd.f32 %v411_v13, %v303_v14 }
  0xf2   : > { %v313_v16 = vmul.f32 0.044715, %v311_v15  ;;  %v312_v22 = vmul.f32 0.5, %v311_v15 }
  0xf4   : > { %v314_v17 = vmul.f32 %v313_v16, %v311_v15 }
  0xf6   : > { %v315_v18 = vmul.f32 %v314_v17, %v311_v15 }
  0xf8   : > { %v316_v19 = vadd.f32 %v315_v18, %v311_v15 }
  0xfa   : > { %v317_v20 = vmul.f32 0.7978846, %v316_v19 }
  0xfc   : > { %463 = vtanh.f32 %v317_v20 }
 0x106   : > { %v464_v21 = vpop.eup %463 }
 0x107   : > { %v319_v23 = vadd.f32 1.0, %v464_v21 }
 0x109   : > { %v320_v24 = vmul.f32 %v319_v23, %v312_v22 }
 0x10b   : > { %321 = vst.msk [vmem:[%s210_s5] sm:$0xff] %vm215_vm0, %v320_v24 }
 0x10c PF: > { %s13_s14 = sadd.s32 1, %s487_s14   ;;  %s567_s12 = smov %s483_s13 }
 0x10d   : > { %p10_p5 = scmp.ge.s32.totalorder %s13_s14, 4   ;;  %s568_s13 = smov %s570_s15 }
 0x10f   :  { %12 = sbr.rel (!%p10_p5) target bundleno = 2 (0x2), region = 73 }

// kernel: basemodel_forward.16
= control target key start
LH: loop header
LB: loop body
LE: loop exit
PB: predicated region body
PF: predicated region fallthrough
CT: control target
= control target key end

     0   :  { %s685_s21 = smov 0   ;;  %s687_s22 = smov 0   ;;  %s764_s0 = inlined_call_operand.vmem [shape: f32[16,64], index: 0, kind: input, shape index: {}]   ;;  %s765_s1 = inlined_call_operand.vmem [shape: f32[64,32], index: 1, kind: input, shape index: {}]   ;;  %s766_s2 = inlined_call_operand.vmem [shape: f32[1,32], index: 2, kind: input, shape index: {}]   ;;  %s767_s3 = inlined_call_operand.vmem [shape: f32[16,32], index: 3, kind: input, shape index: {}]   ;;  %s768_s4 = inlined_call_operand.vmem [shape: f32[1,32], index: 4, kind: input, shape index: {}]   ;;  %s769_s5 = inlined_call_operand.vmem [shape: f32[1,32], index: 5, kind: input, shape index: {}]   ;;  %s770_s6 = inlined_call_operand.vmem [shape: f32[16,32], index: 6, kind: output, shape index: {}]  }
   0x1   :  { %s689_s23 = smov 0  }
   0x2 LB: > { %s28_s24 = sadd.s32 1, %s641_s22  ;;  %p544_p0 = scmp.ge.s32.totalorder %s645_s23, 1  ;;  %s645_s23 = sphi %s689_s23, %s16_s23   ;;  %s641_s22 = sphi %s687_s22, %s772_s22   ;;  %s637_s21 = sphi %s685_s21, %s771_s21  }
   0x3   : > { %p30_p1 = scmp.ge.s32.totalorder %s28_s24, 2  ;;  %p248_p2 = scmp.lt.s32.totalorder %s645_s23, 3 }
   0x5   : > { %s774_s24 = smov (%p30_p1, %s28_s24), 0  ;;  %p249_p3 = pnand %p544_p0, %p248_p2 }
   0x6   : > { %v317_v0 = vld [vmem:[%s765_s1] sm:$0xff] (!%p249_p3)  ;;  %v318_v1 = vld [vmem:[%s765_s1 + $0x8] sm:$0xff] (!%p249_p3)  ;;  %v319_v2 = vld [vmem:[%s765_s1 + $0x10] sm:$0xff] (!%p249_p3)  ;;  %vm313_vm0 = vcmask (!%p249_p3), 261120   ;;  %v647_v3 = vmov (!%p249_p3), 0.0|0.0   ;;  %v648_v6 = vmov (!%p249_p3), 0.0  }
   0x7   : > { %252 = sbr.rel (%p249_p3) target bundleno = 564 (0x234), region = 44  ;;  %582 = vmatprep.subr.bf16.mxu0 (!%p249_p3), %v647_v3  ;;  %v583_v4 = vpack.c.bf16 (!%p249_p3), %v318_v1, %v317_v0  ;;  %v320_v5 = vld [vmem:[%s765_s1 + $0x18] sm:$0xff] (!%p249_p3)  ;;  %314 = vst.msk [vmem:[#allocation2] sm:$0xff] (!%p249_p3), %vm313_vm0, %v648_v6  ;;  %p288_p4 = scmp.lt.s32.totalorder (!%p249_p3), %s637_s21, 1  ;;  %vm649_vm1 = vmmov (!%p249_p3), 0   ;;  %v321_v8 = vld [vmem:[%s765_s1 + $0x20] sm:$0xff] (!%p249_p3) }
   0x8   : > { %579 = vmatprep.mubr.msk.f32.mxu0 (!%p249_p3), %vm649_vm1, %v648_v6  ;;  %v586_v7 = vpack.c.bf16 (!%p249_p3), %v320_v5, %v319_v2  ;;  %v322_v9 = vld [vmem:[%s765_s1 + $0x28] sm:$0xff] (!%p249_p3)  ;;  %v323_v11 = vld [vmem:[%s765_s1 + $0x30] sm:$0xff] (!%p249_p3)  ;;  %v324_v12 = vld [vmem:[%s765_s1 + $0x38] sm:$0xff] (!%p249_p3)  ;;  %vm325_vm2 = vcmask (!%p249_p3), 523264  }
   0x9   : > { %584 = vmatpush3.bf16.msra.mxu0 (!%p249_p3), %v583_v4  ;;  %v589_v10 = vpack.c.bf16 (!%p249_p3), %v322_v9, %v321_v8  ;;  %v592_v13 = vpack.c.bf16 (!%p249_p3), %v324_v12, %v323_v11  ;;  %v549_v19 = vld [vmem:[%s766_s2] ss:$0 sm:$0xff] (!%p249_p3) }
   0xa   : > { %585 = vmatprep.subr.bf16.mxu0 (!%p249_p3), %v647_v3  ;;  %v550_v34 = vld [vmem:[%s768_s4] ss:$0 sm:$0xff] (!%p249_p3) }
   0xb   : > { %v551_v36 = vld [vmem:[%s769_s5] ss:$0 sm:$0xff] (!%p249_p3) }
   0xd   : > { %587 = vmatpush3.bf16.msra.mxu0 (!%p249_p3), %v586_v7 }
   0xe   : > { %s776_s21 = smov (!%p288_p4, %s637_s21), 1  ;;  %588 = vmatprep.subr.bf16.mxu0 %v647_v3  ;;  %v315_v15 = vld [vmem:[#allocation2] sm:$0xff] }
   0xf   : > { %s728_s17 = sshll.u32 %s776_s21, 3 }
  0x10   : > { %s294_s20 = scalar_lea.vmem %s764_s0, %s728_s17  ;;  %s304_s26 = scalar_lea.vmem %s767_s3, %s728_s17 }
  0x11   : > { %590 = vmatpush3.bf16.msra.mxu0 %v589_v10  ;;  %v316_v14 = vld [vmem:[%s294_s20] sm:$0xff]  ;;  %s308_s11 = scalar_lea.vmem %s770_s6, %s728_s17 }
  0x12   : > { %591 = vmatprep.subr.bf16.mxu0 %v647_v3  ;;  %v414_v21 = vld [vmem:[%s304_s26] sm:$0xff] }
  0x15   : > { %593 = vmatpush3.bf16.msra.mxu0 %v592_v13 }
  0x18   : > { %580 = vmatmul.mubr.msk.f32.vlgmr.msra.gmra.mrb[0].mxu0 %vm325_vm2, %v316_v14 }
  0xeb   : > { %v395_v16 = vpop.f32.mrb[0].mxu0 }
  0xec   : > { %v399_v17 = vadd.f32 %v395_v16, %v315_v15  ;;  %v581_v18 = vpop.f32.mrb[1].mxu0 }
  0xee   : > { %401 = vst.msk [vmem:[#allocation2] sm:$0xff] %vm313_vm0, %v399_v17 }
  0xf5   : > { %v405_v20 = vld [vmem:[#allocation2] sm:$0xff] }
  0xf6   : > { %v413_v22 = vadd.f32 %v549_v19, %v405_v20 }
  0xf8   : > { %v415_v23 = vadd.f32 %v414_v21, %v413_v22 }
  0xfa   : > { %v416_v24 = vsel %vm313_vm0, %v415_v23, 0.0 }
  0xfb   : > { %417 = vadd.xlane.f32.xlu0 %v416_v24 }
 0x188   : > { %v418_v25 = vpop.xlane.xlu0 %417 }
 0x189   : > { %v420_v26 = vmul.f32 0.03125, %v418_v25 }
 0x18b   : > { %v421_v27 = vsub.f32 %v415_v23, %v420_v26 }
 0x18d   : > { %v422_v28 = vmul.f32 %v421_v27, %v421_v27 }
 0x18f   : > { %v423_v29 = vsel %vm313_vm0, %v422_v28, 0.0 }
 0x190   : > { %424 = vadd.xlane.f32.xlu0 %v423_v29 }
 0x21d   : > { %v425_v30 = vpop.xlane.xlu0 %424 }
 0x21e   : > { %v426_v31 = vmul.f32 0.03125, %v425_v30 }
 0x220   : > { %v427_v32 = vadd.f32 1e-12, %v426_v31 }
 0x222   : > { %621 = vrsqrt.f32 %v427_v32 }
 0x22c   : > { %v622_v33 = vpop.eup %621 }
 0x22d   : > { %v429_v35 = vmul.f32 %v622_v33, %v421_v27 }
 0x22f   : > { %v437_v37 = vmul.f32 %v550_v34, %v429_v35 }
 0x231   : > { %v445_v38 = vadd.f32 %v551_v36, %v437_v37 }
 0x233   : > { %446 = vst.msk [vmem:[%s308_s11] sm:$0xff] %vm313_vm0, %v445_v38 }
 0x234 PF: > { %s16_s23 = sadd.s32 1, %s645_s23   ;;  %s771_s21 = smov %s641_s22 }
 0x235   : > { %p13_p5 = scmp.ge.s32.totalorder %s16_s23, 4   ;;  %s772_s22 = smov %s774_s24 }
 0x237   :  { %15 = sbr.rel (!%p13_p5) target bundleno = 2 (0x2), region = 88 }

// kernel: basemodel_forward.21
= control target key start
LH: loop header
LB: loop body
LE: loop exit
PB: predicated region body
PF: predicated region fallthrough
CT: control target
= control target key end

     0   :  { %11 = vsyncpa [#allocation4], 0  ;;  %s947_s0 = inlined_call_operand.vmem [shape: f32[16,64], index: 0, kind: input, shape index: {}]   ;;  %s948_s1 = inlined_call_operand.vmem [shape: f32[64,32], index: 1, kind: input, shape index: {}]   ;;  %s949_s2 = inlined_call_operand.vmem [shape: f32[1,32], index: 2, kind: input, shape index: {}]   ;;  %s950_s3 = inlined_call_operand.vmem [shape: f32[16,32], index: 3, kind: input, shape index: {}]   ;;  %s951_s4 = inlined_call_operand.vmem [shape: f32[1,32], index: 4, kind: input, shape index: {}]   ;;  %s952_s5 = inlined_call_operand.vmem [shape: f32[1,32], index: 5, kind: input, shape index: {}]   ;;  %s953_s6 = inlined_call_operand.hbm [shape: f32[16,32], index: 6, kind: output, shape index: {}]  }
   0x1   :  { %13 = vsyncpa [#allocation4 + $0x1], 0  ;;  %s794_s21 = smov 0   ;;  %s796_s22 = smov 0  }
   0x2   :  { %s798_s23 = smov 0   ;;  %s800_s24 = smov 0  }
   0x3   :  { %s802_s25 = smov 0   ;;  %s804_s26 = smov 0  }
   0x4 LB: > { %s558_s27 = sadd.s32 4294967295, %s753_s26   ;;  %s559_s28 = sadd.s32 4294967294, %s753_s26   ;;  %s753_s26 = sphi %s804_s26, %s19_s26   ;;  %s749_s25 = sphi %s802_s25, %s960_s25   ;;  %s745_s24 = sphi %s800_s24, %s959_s24   ;;  %s741_s23 = sphi %s798_s23, %s958_s23   ;;  %s737_s22 = sphi %s796_s22, %s957_s22   ;;  %s733_s21 = sphi %s794_s21, %s956_s21  }
   0x5   : > { %s31_s29 = sadd.s32 1, %s749_s25  ;;  %s181_s30 = sadd.s32 1, %s741_s23 }
   0x6   : > { %p33_p0 = scmp.ge.s32.totalorder %s31_s29, 2  ;;  %p191_p1 = scmp.ne.s32.totalorder %s741_s23, %s737_s22 }
   0x7   : > { %p192_p2 = scmp.eq.s32.totalorder %s558_s27, 1  ;;  %p197_p3 = scmp.ne.s32.totalorder %s737_s22, %s733_s21 }
   0x8   : > { %s962_s29 = smov (%p33_p0, %s31_s29), 0  ;;  %p198_p5 = scmp.eq.s32.totalorder %s559_s28, 1 }
   0x9   : > { %p834_p4 = por %p192_p2, %p191_p1  ;;  %s178_s8 = ssub.s32 %s749_s25, %s962_s29 }
   0xa   : > { %p563_p6 = scmp.ge.s32.totalorder %s753_s26, 1  ;;  %p179_p7 = scmp.eq.s32.totalorder %s178_s8, 0 }
   0xb   : > { %p841_p8 = por %p198_p5, %p197_p3  ;;  %p251_p9 = scmp.lt.s32.totalorder %s753_s26, 3 }
   0xc   : > { %s847_s10 = scalar_select %p179_p7, %s741_s23, %s181_s30  }
   0xd   : > { %p252_p10 = pnand %p563_p6, %p251_p9 }
   0xe   : > { %v317_v0 = vld [vmem:[%s948_s1] sm:$0xff] (!%p252_p10)  ;;  %v318_v1 = vld [vmem:[%s948_s1 + $0x8] sm:$0xff] (!%p252_p10)  ;;  %v319_v2 = vld [vmem:[%s948_s1 + $0x10] sm:$0xff] (!%p252_p10)  ;;  %vm313_vm0 = vcmask (!%p252_p10), 261120   ;;  %v755_v3 = vmov (!%p252_p10), 0.0|0.0   ;;  %v756_v6 = vmov (!%p252_p10), 0.0  }
   0xf   : > { %255 = sbr.rel (%p252_p10) target bundleno = 585 (0x249), region = 44  ;;  %603 = vmatprep.subr.bf16.mxu0 (!%p252_p10), %v755_v3  ;;  %v604_v4 = vpack.c.bf16 (!%p252_p10), %v318_v1, %v317_v0  ;;  %v320_v5 = vld [vmem:[%s948_s1 + $0x18] sm:$0xff] (!%p252_p10)  ;;  %314 = vst.msk [vmem:[#allocation2] sm:$0xff] (!%p252_p10), %vm313_vm0, %v756_v6  ;;  %p292_p11 = scmp.lt.s32.totalorder (!%p252_p10), %s745_s24, 1  ;;  %vm757_vm1 = vmmov (!%p252_p10), 0   ;;  %v321_v8 = vld [vmem:[%s948_s1 + $0x20] sm:$0xff] (!%p252_p10) }
  0x10   : > { %600 = vmatprep.mubr.msk.f32.mxu0 (!%p252_p10), %vm757_vm1, %v756_v6  ;;  %v607_v7 = vpack.c.bf16 (!%p252_p10), %v320_v5, %v319_v2  ;;  %v322_v9 = vld [vmem:[%s948_s1 + $0x28] sm:$0xff] (!%p252_p10)  ;;  %v323_v11 = vld [vmem:[%s948_s1 + $0x30] sm:$0xff] (!%p252_p10)  ;;  %v324_v12 = vld [vmem:[%s948_s1 + $0x38] sm:$0xff] (!%p252_p10)  ;;  %vm325_vm2 = vcmask (!%p252_p10), 523264   ;;  %s572_s15 = sshll.u32 (!%p252_p10), %s745_s24, 7 }
  0x11   : > { %605 = vmatpush3.bf16.msra.mxu0 (!%p252_p10), %v604_v4  ;;  %v610_v10 = vpack.c.bf16 (!%p252_p10), %v322_v9, %v321_v8  ;;  %v613_v13 = vpack.c.bf16 (!%p252_p10), %v324_v12, %v323_v11  ;;  %v568_v19 = vld [vmem:[%s949_s2] ss:$0 sm:$0xff] (!%p252_p10) }
  0x12   : > { %606 = vmatprep.subr.bf16.mxu0 (!%p252_p10), %v755_v3  ;;  %v569_v34 = vld [vmem:[%s951_s4] ss:$0 sm:$0xff] (!%p252_p10) }
  0x13   : > { %v570_v36 = vld [vmem:[%s952_s5] ss:$0 sm:$0xff] (!%p252_p10) }
  0x15   : > { %608 = vmatpush3.bf16.msra.mxu0 (!%p252_p10), %v607_v7 }
  0x16   : > { %s293_s30 = scalar_select %p292_p11, %s745_s24, 1  ;;  %609 = vmatprep.subr.bf16.mxu0 %v755_v3  ;;  %v315_v15 = vld [vmem:[#allocation2] sm:$0xff] }
  0x17   : > { %s758_s24 = smov [#allocation3]  }
  0x18   : > { %s565_s14 = sshll.u32 %s293_s30, 3  ;;  %s289_s30 = sand.u32 1, %s737_s22  }
  0x19   : > { %611 = vmatpush3.bf16.msra.mxu0 %v610_v10  ;;  %s298_s17 = scalar_lea.vmem %s947_s0, %s565_s14  ;;  %s308_s20 = scalar_lea.vmem %s950_s3, %s565_s14 }
  0x1a   : > { %612 = vmatprep.subr.bf16.mxu0 %v755_v3  ;;  %v316_v14 = vld [vmem:[%s298_s17] sm:$0xff]  ;;  %s564_s8 = sshll.u32 %s289_s30, 3  ;;  %s448_s27 = scalar_lea.sflag [#allocation4], %s289_s30 }
  0x1b   : > { %v414_v21 = vld [vmem:[%s308_s20] sm:$0xff]  ;;  %s291_s16 = scalar_lea.vmem [#allocation3], %s564_s8  ;;  %s899_s20 = scalar_lea.hbm %s953_s6, %s572_s15 }
  0x1c   : > { %s461_s17 = sshll.u32 %s291_s16, 4  ;;  %s679_s8 = sshll.u32 %s758_s24, 4  ;;  %s901_s17 = int_to_ptr.vmem [resolvable:$true] %s461_s17  ;;  %s680_s8 = int_to_ptr.vmem [resolvable:$false] %s679_s8 }
  0x1d   : > { %614 = vmatpush3.bf16.msra.mxu0 %v613_v13  ;;  %s675_s28 = scalar_lea.vmem %s901_s17, 128  ;;  %s681_s11 = scalar_lea.vmem %s680_s8, 256 }
  0x1e   : > { %p676_p12 = scmp.ne.s32.totalorder %s901_s17, %s675_s28  ;;  %p682_p1 = scmp.lt.s32.totalorder %s901_s17, %s680_s8 }
  0x1f   : > { %p683_p2 = scmp.lt.s32.totalorder %s681_s11, %s675_s28 }
  0x20   : > { %601 = vmatmul.mubr.msk.f32.vlgmr.msra.gmra.mrb[0].mxu0 %vm325_vm2, %v316_v14  ;;  %p677_p13 = pnand %p676_p12, %p834_p4 }
  0x21   : > { %p684_p3 = por %p683_p2, %p682_p1 }
  0x22   : > { %p678_p0 = pneg %p677_p13 }
  0x24   : > { %p685_p5 = pnand %p684_p3, %p678_p0 }
  0xf3   : > { %v395_v16 = vpop.f32.mrb[0].mxu0 }
  0xf4   : > { %v399_v17 = vadd.f32 %v395_v16, %v315_v15  ;;  %v602_v18 = vpop.f32.mrb[1].mxu0 }
  0xf6   : > { %401 = vst.msk [vmem:[#allocation2] sm:$0xff] %vm313_vm0, %v399_v17 }
  0xfd   : > { %v405_v20 = vld [vmem:[#allocation2] sm:$0xff] }
  0xfe   : > { %v413_v22 = vadd.f32 %v568_v19, %v405_v20 }
 0x100   : > { %v415_v23 = vadd.f32 %v414_v21, %v413_v22 }
 0x102   : > { %v416_v24 = vsel %vm313_vm0, %v415_v23, 0.0 }
 0x103   : > { %417 = vadd.xlane.f32.xlu0 %v416_v24 }
 0x190   : > { %v418_v25 = vpop.xlane.xlu0 %417 }
 0x191   : > { %v420_v26 = vmul.f32 0.03125, %v418_v25 }
 0x193   : > { %v421_v27 = vsub.f32 %v415_v23, %v420_v26 }
 0x195   : > { %v422_v28 = vmul.f32 %v421_v27, %v421_v27 }
 0x197   : > { %v423_v29 = vsel %vm313_vm0, %v422_v28, 0.0 }
 0x198   : > { %424 = vadd.xlane.f32.xlu0 %v423_v29 }
 0x225   : > { %v425_v30 = vpop.xlane.xlu0 %424 }
 0x226   : > { %v426_v31 = vmul.f32 0.03125, %v425_v30 }
 0x228   : > { %v427_v32 = vadd.f32 1e-12, %v426_v31 }
 0x22a   : > { %673 = vrsqrt.f32 %v427_v32 }
 0x234   : > { %v674_v33 = vpop.eup %673 }
 0x235   : > { %v429_v35 = vmul.f32 %v674_v33, %v421_v27 }
 0x237   : > { %v437_v37 = vmul.f32 %v569_v34, %v429_v35 }
 0x239   : > { %v445_v38 = vadd.f32 %v570_v36, %v437_v37 }
 0x23b   : > { %446 = vst.msk [vmem:[%s291_s16] sm:$0xff] %vm313_vm0, %v445_v38 }
 0x23c   : > { %688 = shalt.err (!%p685_p5)
}
 0x23d   : > { %s689_s30 = scalar_lea.hbm %s899_s20, 128  ;;  %s693_s14 = scalar_lea.hbm %s953_s6, 256 }
 0x23e   : > { %p690_p6 = scmp.ne.s32.totalorder %s899_s20, %s689_s30  ;;  %p694_p10 = scmp.lt.u32.totalorder %s899_s20, %s953_s6 }
 0x23f   : > { %p695_p11 = scmp.lt.u32.totalorder %s693_s14, %s689_s30  ;;  %p697_p13 = scmp.lt.u32.totalorder %s689_s30, %s899_s20 }
 0x240   : > { %p691_p7 = pnand %p690_p6, %p834_p4 }
 0x241   : > { %p696_p12 = por %p695_p11, %p694_p10 }
 0x242   : > { %p692_p9 = pneg %p691_p7 }
 0x243   : > { %p698_p0 = por %p697_p13, %p696_p12 }
 0x245   : > { %p699_p1 = pnand %p698_p0, %p692_p9 }
 0x247   : > { %702 = shalt.err (!%p699_p1)
}
 0x248   : > { %615 = dma.vmem_to_hbm [thread:$0]  (%p834_p4), %s901_s17, 128, %s899_s20, %s448_s27  }
 0x249 PF: > { %p621_p2 = scmp.ge.s32.totalorder %s753_s26, 2  ;;  %s473_s18 = sand.u32 1, %s733_s21  }
 0x24a   : > { %s474_s19 = scalar_lea.sflag [#allocation4], %s473_s18 }
 0x24b   : > { %p618_p3 = pnand %p621_p2, %p841_p8 }
 0x24d   : > { %728 = dma.done.wait (!%p618_p3), %s474_s19, 128  }
 0x24e   : > { %730 = vsyncadd (!%p618_p3), %s474_s19, 4294967168  ;;  %s19_s26 = sadd.s32 1, %s753_s26   ;;  %s956_s21 = smov %s737_s22 }
 0x24f   : > { %p16_p5 = scmp.ge.s32.totalorder %s19_s26, 4   ;;  %s957_s22 = smov %s741_s23 }
 0x250   : > { %s958_s23 = smov %s847_s10  ;;  %s959_s24 = smov %s749_s25 }
 0x251   : > { %s960_s25 = smov %s962_s29  ;;  %18 = sbr.rel (!%p16_p5) target bundleno = 4 (0x4), region = 93 }
 0x258   :  { %479 = vsyncpa [#allocation4], 1 }
 0x259   :  { %481 = vsyncpa [#allocation4 + $0x1], 1 }

</bundles_post_ra>
